<compile_context>
chip_gen: v5e
topology: v5e:2x2
jax: 0.10.0
libtpu: 0.0.40
codegen_flags: <defaults>
</compile_context>

<pallas_src>
import jax
import jax.numpy as jnp
from jax.experimental import pallas as pl
from jax.experimental.pallas import tpu as pltpu

LANE = 128     # channel (lane) alignment
SUBLANE = 8    # row (sublane) alignment


def _round_up(x, m):
    return (x + m - 1) // m * m


def _ceil_div(a, b):
    return -(-a // b)


# ---------------------------------------------------------------------------
# Kernels
# ---------------------------------------------------------------------------
def _resnet_block_kernel_proj(x_ref, w1_ref, b1_ref, w2_ref, ws_ref, bf_ref, o_ref):
    """Main branch + 1x1 projection shortcut (in_planes != out_planes)."""
    x = x_ref[...]                                                  # (T, Cin_p) bf16
    h1 = jnp.dot(x, w1_ref[...], preferred_element_type=jnp.float32) + b1_ref[...]
    h1 = jnp.maximum(h1, 0.0).astype(jnp.bfloat16)
    h2 = jnp.dot(h1, w2_ref[...], preferred_element_type=jnp.float32)
    side = jnp.dot(x, ws_ref[...], preferred_element_type=jnp.float32)
    # bf_ref = folded (bn2 bias + side_bn bias), added once after the residual sum
    o_ref[...] = jnp.maximum(h2 + side + bf_ref[...], 0.0)


def _resnet_block_kernel_id(x_ref, w1_ref, b1_ref, w2_ref, bf_ref, o_ref):
    """Main branch + identity shortcut (in_planes == out_planes): no side matmul."""
    x = x_ref[...]                                                  # (T, C_p) bf16
    h1 = jnp.dot(x, w1_ref[...], preferred_element_type=jnp.float32) + b1_ref[...]
    h1 = jnp.maximum(h1, 0.0).astype(jnp.bfloat16)
    h2 = jnp.dot(h1, w2_ref[...], preferred_element_type=jnp.float32)
    o_ref[...] = jnp.maximum(h2 + x.astype(jnp.float32) + bf_ref[...], 0.0)


# ---------------------------------------------------------------------------
# BN folding / padding helpers
# ---------------------------------------------------------------------------
def _fold_bn(w, b, gamma, beta, mean, var, eps=1e-5):
    """Fold a 1x1 conv weight (C_out, C_in) + bias with eval-mode BN into a
    (C_in, C_out) matmul weight and a (C_out,) bias (both f32)."""
    scale = gamma / jnp.sqrt(var + eps)                 # (C_out,)
    shift = beta - mean * scale                         # (C_out,)
    w_f = w.T * scale[None, :]                          # (C_in, C_out)
    b_f = b * scale + shift                             # (C_out,)
    return w_f.astype(jnp.float32), b_f.astype(jnp.float32)


def _pad2(w, rows, cols):
    r, c = w.shape
    return jnp.pad(w, ((0, rows - r), (0, cols - c)))


def _pad1(b, cols):
    return jnp.pad(b, (0, cols - b.shape[0]))


def _const_spec(shape, use_buffered):
    """Grid-invariant operand: single-buffer it (no point double-buffering)."""
    if use_buffered:
        return pl.BlockSpec(shape, lambda i: (0, 0), pipeline_mode=pl.Buffered(1))
    return pl.BlockSpec(shape, lambda i: (0, 0))


# ---------------------------------------------------------------------------
# Forward wrappers
# ---------------------------------------------------------------------------
def resnet_block_forward_rows(x_rows, params, *, row_tile=512):
    """x_rows: (R, C_in) channels-last flattened pixels -> (R, C_out) float32."""
    R, C_in = x_rows.shape

    # ---- fold eval-mode BN into the 1x1 convs ----
    w1f, b1f = _fold_bn(params["w1"], params["b1"], params["g1"], params["be1"],
                        params["m1"], params["v1"])
    w2f, b2f = _fold_bn(params["w2"], params["b2"], params["g2"], params["be2"],
                        params["m2"], params["v2"])
    C_out = w1f.shape[1]
    identity_shortcut = (C_in == C_out) and (params.get("ws") is None)

    # ---- lane-dense channel padding (multiples of 128) ----
    C_in_p = _round_up(C_in, LANE)
    C_out_p = _round_up(C_out, LANE)

    w1p = _pad2(w1f, C_in_p, C_out_p).astype(jnp.bfloat16)
    w2p = _pad2(w2f, C_out_p, C_out_p).astype(jnp.bfloat16)
    b1p = _pad1(b1f, C_out_p)[None, :]                          # (1, C_out_p) f32

    if identity_shortcut:
        b_final = _pad1(b2f, C_out_p)[None, :]
        wsp = None
    else:
        wsf, bsf = _fold_bn(params["ws"], params["bs"], params["gs"],
                            params["bes"], params["ms"], params["vs"])
        wsp = _pad2(wsf, C_in_p, C_out_p).astype(jnp.bfloat16)
        b_final = _pad1(b2f + bsf, C_out_p)[None, :]            # fold both biases

    # ---- balanced row tiling ----
    # conservative VMEM estimate: double-buffered x/out tiles + weights + biases
    def vmem_est(t):
        return (2 * t * C_in_p * 2 + 2 * t * C_out_p * 4
                + 2 * (C_in_p + 2 * C_out_p) * C_out_p * 2 + 4 * C_out_p * 4)

    rt_cap = max(min(int(row_tile), _round_up(R, SUBLANE)), SUBLANE)
    n_steps = max(_ceil_div(R, rt_cap), 1)
    if n_steps == 1 and R >= 512:
        n_steps = 2                                   # split for megacore
    rt = max(_round_up(_ceil_div(R, n_steps), SUBLANE), SUBLANE)
    while rt > 256 and vmem_est(rt) > (48 << 20):     # keep tiles in a safe budget
        n_steps += 1
        rt = max(_round_up(_ceil_div(R, n_steps), SUBLANE), SUBLANE)

    R_pad = n_steps * rt
    grid = n_steps

    x_p = x_rows.astype(jnp.bfloat16)
    if C_in_p != C_in or R_pad != R:
        x_p = jnp.pad(x_p, ((0, R_pad - R), (0, C_in_p - C_in)))

    vmem_limit = min(max(int(1.5 * vmem_est(rt)) + (4 << 20), 32 << 20), 56 << 20)

    def launch(use_buffered):
        if identity_shortcut:
            kernel = _resnet_block_kernel_id
            const_ops = [(w1p, (C_in_p, C_out_p)), (b1p, (1, C_out_p)),
                         (w2p, (C_out_p, C_out_p)), (b_final, (1, C_out_p))]
        else:
            kernel = _resnet_block_kernel_proj
            const_ops = [(w1p, (C_in_p, C_out_p)), (b1p, (1, C_out_p)),
                         (w2p, (C_out_p, C_out_p)), (wsp, (C_in_p, C_out_p)),
                         (b_final, (1, C_out_p))]
        in_specs = [pl.BlockSpec((rt, C_in_p), lambda i: (i, 0))]
        in_specs += [_const_spec(shape, use_buffered) for _, shape in const_ops]
        return pl.pallas_call(
            kernel,
            out_shape=jax.ShapeDtypeStruct((R_pad, C_out_p), jnp.float32),
            grid_spec=pltpu.PrefetchScalarGridSpec(
                num_scalar_prefetch=0,
                grid=(grid,),
                in_specs=in_specs,
                out_specs=pl.BlockSpec((rt, C_out_p), lambda i: (i, 0)),
            ),
            compiler_params=pltpu.CompilerParams(
                dimension_semantics=("parallel",),
                vmem_limit_bytes=vmem_limit),
        )(x_p, *[a for a, _ in const_ops])

    try:
        out_rows = launch(use_buffered=True)
    except Exception:
        # pipeline_mode=pl.Buffered(1) unsupported on this jax build; fall back
        # to default double-buffered grid-invariant operands (tiny VMEM cost).
        out_rows = launch(use_buffered=False)

    return out_rows[:R, :C_out]


def resnet_block_forward_nhwc(x_nhwc, params, *, row_tile=512):
    """Preferred entry point for chained blocks: stays channels-last, no transposes."""
    N, H, W, C = x_nhwc.shape
    out_rows = resnet_block_forward_rows(x_nhwc.reshape(N * H * W, C), params,
                                         row_tile=row_tile)
    return out_rows.reshape(N, H, W, -1)


def resnet_block_forward(x_nchw, params, *, row_tile=512):
    """NCHW compatibility wrapper (matches the PyTorch layout). For chained
    blocks prefer resnet_block_forward_nhwc to avoid two full-tensor HBM
    transposes per block."""
    x_nhwc = jnp.transpose(x_nchw, (0, 2, 3, 1))
    out = resnet_block_forward_nhwc(x_nhwc, params, row_tile=row_tile)
    return jnp.transpose(out, (0, 3, 1, 2))


# ---------------------------------------------------------------------------
# Parameters + pure-JAX reference (for verification)
# ---------------------------------------------------------------------------
def make_params(key, in_planes, out_planes):
    ks = jax.random.split(key, 10)

    def conv_w(k, co, ci):
        return jax.random.normal(k, (co, ci), jnp.float32) * (1.0 / jnp.sqrt(ci))

    params = {
        "w1": conv_w(ks[0], out_planes, in_planes),
        "b1": jax.random.normal(ks[1], (out_planes,), jnp.float32) * 0.1,
        "g1": 1.0 + 0.1 * jax.random.normal(ks[2], (out_planes,), jnp.float32),
        "be1": 0.1 * jax.random.normal(ks[3], (out_planes,), jnp.float32),
        "m1": 0.05 * jax.random.normal(ks[4], (out_planes,), jnp.float32),
        "v1": jnp.abs(1.0 + 0.1 * jax.random.normal(ks[5], (out_planes,), jnp.float32)),
        "w2": conv_w(ks[6], out_planes, out_planes),
        "b2": jax.random.normal(ks[7], (out_planes,), jnp.float32) * 0.1,
        "g2": jnp.ones((out_planes,), jnp.float32),
        "be2": jnp.zeros((out_planes,), jnp.float32),
        "m2": jnp.zeros((out_planes,), jnp.float32),
        "v2": jnp.ones((out_planes,), jnp.float32),
    }
    if in_planes != out_planes:
        params.update({
            "ws": conv_w(ks[8], out_planes, in_planes),
            "bs": jax.random.normal(ks[9], (out_planes,), jnp.float32) * 0.1,
            "gs": jnp.ones((out_planes,), jnp.float32),
            "bes": jnp.zeros((out_planes,), jnp.float32),
            "ms": jnp.zeros((out_planes,), jnp.float32),
            "vs": jnp.ones((out_planes,), jnp.float32),
        })
    else:
        params["ws"] = None
    return params


def reference_forward(x, p, in_planes, out_planes, eps=1e-5):
    """Pure-JAX reference of ResnetBlock.forward (eval-mode BN)."""
    def conv1x1(x, w, b):  # x: NCHW, w: (Co, Ci)
        return jnp.einsum("nchw,oc->nohw", x, w) + b[None, :, None, None]

    def bn(x, g, be, m, v):
        s = g / jnp.sqrt(v + eps)
        return x * s[None, :, None, None] + (be - m * s)[None, :, None, None]

    out = jax.nn.relu(bn(conv1x1(x, p["w1"], p["b1"]), p["g1"], p["be1"], p["m1"], p["v1"]))
    out = bn(conv1x1(out, p["w2"], p["b2"]), p["g2"], p["be2"], p["m2"], p["v2"])
    if in_planes == out_planes:
        ind_x = x
    else:
        ind_x = bn(conv1x1(x, p["ws"], p["bs"]), p["gs"], p["bes"], p["ms"], p["vs"])
    return jax.nn.relu(ind_x + out)


if __name__ == "__main__":
    key = jax.random.PRNGKey(0)
    k_x1, k_p1, k_x2, k_p2 = jax.random.split(key, 4)

    # projection-shortcut case (in_planes != out_planes)
    N, C_in, C_out, H, W = 2, 4, 8, 16, 16
    x1 = jax.random.normal(k_x1, (N, C_in, H, W), jnp.float32)
    p1 = make_params(k_p1, C_in, C_out)
    out1 = jax.block_until_ready(resnet_block_forward(x1, p1))
    ref1 = reference_forward(x1, p1, C_in, C_out)
    assert out1.shape == (N, C_out, H, W)
    # bf16 MXU inputs -> loosened tolerance vs f32 reference (expected)
    assert jnp.allclose(out1, ref1, atol=5e-2, rtol=5e-2), "projection-case mismatch"

    # identity-shortcut case (in_planes == out_planes) -> specialized kernel
    C = 8
    x2 = jax.random.normal(k_x2, (N, C, H, W), jnp.float32)
    p2 = make_params(k_p2, C, C)
    out2 = jax.block_until_ready(resnet_block_forward(x2, p2))
    ref2 = reference_forward(x2, p2, C, C)
    assert out2.shape == (N, C, H, W)
    assert jnp.allclose(out2, ref2, atol=5e-2, rtol=5e-2), "identity-case mismatch"

    print("KERNEL_OK")
</pallas_src>

<mosaic_0001>
module attributes {stable_mosaic.version = 11 : i64} {
  func.func @_resnet_block_kernel_proj(%arg0: i32, %arg1: memref<256x128xbf16, #tpu.memory_space<vmem>>, %arg2: memref<128x128xbf16, #tpu.memory_space<vmem>>, %arg3: memref<1x128xf32, #tpu.memory_space<vmem>>, %arg4: memref<128x128xbf16, #tpu.memory_space<vmem>>, %arg5: memref<128x128xbf16, #tpu.memory_space<vmem>>, %arg6: memref<1x128xf32, #tpu.memory_space<vmem>>, %arg7: memref<256x128xf32, #tpu.memory_space<vmem>>) attributes {dimension_semantics = [#tpu.dimension_semantics<parallel>], iteration_bounds = array<i64: 2>, scalar_prefetch = 0 : i64, scratch_operands = 0 : i64, tpu.core_type = #tpu.core_type<tc>, window_params = [{transform_indices = @transform_0, window_bounds = array<i64: 256, 128>}, {pipeline_mode = #tpu.pipeline_mode<synchronous>, transform_indices = @transform_1, window_bounds = array<i64: 128, 128>}, {pipeline_mode = #tpu.pipeline_mode<synchronous>, transform_indices = @transform_2, window_bounds = array<i64: 1, 128>}, {pipeline_mode = #tpu.pipeline_mode<synchronous>, transform_indices = @transform_3, window_bounds = array<i64: 128, 128>}, {pipeline_mode = #tpu.pipeline_mode<synchronous>, transform_indices = @transform_4, window_bounds = array<i64: 128, 128>}, {pipeline_mode = #tpu.pipeline_mode<synchronous>, transform_indices = @transform_5, window_bounds = array<i64: 1, 128>}, {transform_indices = @transform_6, window_bounds = array<i64: 256, 128>}]} {
    %c0 = arith.constant 0 : index
    %c0_0 = arith.constant 0 : index
    %0 = vector.load %arg1[%c0, %c0_0] : memref<256x128xbf16, #tpu.memory_space<vmem>>, vector<256x128xbf16>
    %c0_1 = arith.constant 0 : index
    %c0_2 = arith.constant 0 : index
    %1 = vector.load %arg2[%c0_1, %c0_2] : memref<128x128xbf16, #tpu.memory_space<vmem>>, vector<128x128xbf16>
    %cst = arith.constant dense<0.000000e+00> : vector<256x128xf32>
    %2 = tpu.matmul %0, %1, %cst {dimension_numbers = #tpu.dot_dimension_numbers<[1], [0], [0], [1], [0, 0, 1, 1], [], []>} : vector<256x128xbf16>, vector<128x128xbf16>, vector<256x128xf32> -> vector<256x128xf32>
    %c0_3 = arith.constant 0 : index
    %c0_4 = arith.constant 0 : index
    %3 = vector.load %arg3[%c0_3, %c0_4] : memref<1x128xf32, #tpu.memory_space<vmem>>, vector<1x128xf32>
    %4 = vector.broadcast %3 : vector<1x128xf32> to vector<256x128xf32>
    %5 = arith.addf %2, %4 : vector<256x128xf32>
    %cst_5 = arith.constant 0.000000e+00 : f32
    %6 = vector.broadcast %cst_5 : f32 to vector<256x128xf32>
    %7 = arith.maximumf %5, %6 : vector<256x128xf32>
    %8 = arith.truncf %7 : vector<256x128xf32> to vector<256x128xbf16>
    %c0_6 = arith.constant 0 : index
    %c0_7 = arith.constant 0 : index
    %9 = vector.load %arg4[%c0_6, %c0_7] : memref<128x128xbf16, #tpu.memory_space<vmem>>, vector<128x128xbf16>
    %cst_8 = arith.constant dense<0.000000e+00> : vector<256x128xf32>
    %10 = tpu.matmul %8, %9, %cst_8 {dimension_numbers = #tpu.dot_dimension_numbers<[1], [0], [0], [1], [0, 0, 1, 1], [], []>} : vector<256x128xbf16>, vector<128x128xbf16>, vector<256x128xf32> -> vector<256x128xf32>
    %c0_9 = arith.constant 0 : index
    %c0_10 = arith.constant 0 : index
    %11 = vector.load %arg5[%c0_9, %c0_10] : memref<128x128xbf16, #tpu.memory_space<vmem>>, vector<128x128xbf16>
    %cst_11 = arith.constant dense<0.000000e+00> : vector<256x128xf32>
    %12 = tpu.matmul %0, %11, %cst_11 {dimension_numbers = #tpu.dot_dimension_numbers<[1], [0], [0], [1], [0, 0, 1, 1], [], []>} : vector<256x128xbf16>, vector<128x128xbf16>, vector<256x128xf32> -> vector<256x128xf32>
    %13 = arith.addf %10, %12 : vector<256x128xf32>
    %c0_12 = arith.constant 0 : index
    %c0_13 = arith.constant 0 : index
    %14 = vector.load %arg6[%c0_12, %c0_13] : memref<1x128xf32, #tpu.memory_space<vmem>>, vector<1x128xf32>
    %15 = vector.broadcast %14 : vector<1x128xf32> to vector<256x128xf32>
    %16 = arith.addf %13, %15 : vector<256x128xf32>
    %cst_14 = arith.constant 0.000000e+00 : f32
    %17 = vector.broadcast %cst_14 : f32 to vector<256x128xf32>
    %18 = arith.maximumf %16, %17 : vector<256x128xf32>
    %c0_15 = arith.constant 0 : index
    %c0_16 = arith.constant 0 : index
    %19 = vector.load %arg7[%c0_15, %c0_16] : memref<256x128xf32, #tpu.memory_space<vmem>>, vector<256x128xf32>
    tpu.vector_store %arg7[%c0_15, %c0_16], %18 {strides = array<i32>} : memref<256x128xf32, #tpu.memory_space<vmem>>, vector<256x128xf32>,
    return
  }
  func.func @transform_0(%arg0: i32) -> (i32, i32) {
    %c0_i32 = arith.constant 0 : i32
    %c0_i32_0 = arith.constant 0 : i32
    return %arg0, %c0_i32 : i32, i32
  }
  func.func @transform_1(%arg0: i32) -> (i32, i32) {
    %c0_i32 = arith.constant 0 : i32
    %c0_i32_0 = arith.constant 0 : i32
    %c0_i32_1 = arith.constant 0 : i32
    return %c0_i32, %c0_i32_0 : i32, i32
  }
  func.func @transform_2(%arg0: i32) -> (i32, i32) {
    %c0_i32 = arith.constant 0 : i32
    %c0_i32_0 = arith.constant 0 : i32
    %c0_i32_1 = arith.constant 0 : i32
    return %c0_i32, %c0_i32_0 : i32, i32
  }
  func.func @transform_3(%arg0: i32) -> (i32, i32) {
    %c0_i32 = arith.constant 0 : i32
    %c0_i32_0 = arith.constant 0 : i32
    %c0_i32_1 = arith.constant 0 : i32
    return %c0_i32, %c0_i32_0 : i32, i32
  }
  func.func @transform_4(%arg0: i32) -> (i32, i32) {
    %c0_i32 = arith.constant 0 : i32
    %c0_i32_0 = arith.constant 0 : i32
    %c0_i32_1 = arith.constant 0 : i32
    return %c0_i32, %c0_i32_0 : i32, i32
  }
  func.func @transform_5(%arg0: i32) -> (i32, i32) {
    %c0_i32 = arith.constant 0 : i32
    %c0_i32_0 = arith.constant 0 : i32
    %c0_i32_1 = arith.constant 0 : i32
    return %c0_i32, %c0_i32_0 : i32, i32
  }
  func.func @transform_6(%arg0: i32) -> (i32, i32) {
    %c0_i32 = arith.constant 0 : i32
    %c0_i32_0 = arith.constant 0 : i32
    return %arg0, %c0_i32 : i32, i32
  }
}

module attributes {stable_mosaic.version = 11 : i64} {
  func.func @_resnet_block_kernel_proj(%arg0: i32, %arg1: memref<256x128xbf16, #tpu.memory_space<vmem>>, %arg2: memref<128x128xbf16, #tpu.memory_space<vmem>>, %arg3: memref<1x128xf32, #tpu.memory_space<vmem>>, %arg4: memref<128x128xbf16, #tpu.memory_space<vmem>>, %arg5: memref<128x128xbf16, #tpu.memory_space<vmem>>, %arg6: memref<1x128xf32, #tpu.memory_space<vmem>>, %arg7: memref<256x128xf32, #tpu.memory_space<vmem>>) attributes {dimension_semantics = [#tpu.dimension_semantics<parallel>], iteration_bounds = array<i64: 2>, scalar_prefetch = 0 : i64, scratch_operands = 0 : i64, tpu.core_type = #tpu.core_type<tc>, window_params = [{transform_indices = @transform_0, window_bounds = array<i64: 256, 128>}, {pipeline_mode = #tpu.pipeline_mode<synchronous>, transform_indices = @transform_1, window_bounds = array<i64: 128, 128>}, {pipeline_mode = #tpu.pipeline_mode<synchronous>, transform_indices = @transform_2, window_bounds = array<i64: 1, 128>}, {pipeline_mode = #tpu.pipeline_mode<synchronous>, transform_indices = @transform_3, window_bounds = array<i64: 128, 128>}, {pipeline_mode = #tpu.pipeline_mode<synchronous>, transform_indices = @transform_4, window_bounds = array<i64: 128, 128>}, {pipeline_mode = #tpu.pipeline_mode<synchronous>, transform_indices = @transform_5, window_bounds = array<i64: 1, 128>}, {transform_indices = @transform_6, window_bounds = array<i64: 256, 128>}]} {
    %c0 = arith.constant 0 : index
    %c0_0 = arith.constant 0 : index
    %0 = vector.load %arg1[%c0, %c0_0] : memref<256x128xbf16, #tpu.memory_space<vmem>>, vector<256x128xbf16>
    %c0_1 = arith.constant 0 : index
    %c0_2 = arith.constant 0 : index
    %1 = vector.load %arg2[%c0_1, %c0_2] : memref<128x128xbf16, #tpu.memory_space<vmem>>, vector<128x128xbf16>
    %cst = arith.constant dense<0.000000e+00> : vector<256x128xf32>
    %2 = tpu.matmul %0, %1, %cst {dimension_numbers = #tpu.dot_dimension_numbers<[1], [0], [0], [1], [0, 0, 1, 1], [], []>} : vector<256x128xbf16>, vector<128x128xbf16>, vector<256x128xf32> -> vector<256x128xf32>
    %c0_3 = arith.constant 0 : index
    %c0_4 = arith.constant 0 : index
    %3 = vector.load %arg3[%c0_3, %c0_4] : memref<1x128xf32, #tpu.memory_space<vmem>>, vector<1x128xf32>
    %4 = vector.broadcast %3 : vector<1x128xf32> to vector<256x128xf32>
    %5 = arith.addf %2, %4 : vector<256x128xf32>
    %cst_5 = arith.constant 0.000000e+00 : f32
    %6 = vector.broadcast %cst_5 : f32 to vector<256x128xf32>
    %7 = arith.maximumf %5, %6 : vector<256x128xf32>
    %8 = arith.truncf %7 : vector<256x128xf32> to vector<256x128xbf16>
    %c0_6 = arith.constant 0 : index
    %c0_7 = arith.constant 0 : index
    %9 = vector.load %arg4[%c0_6, %c0_7] : memref<128x128xbf16, #tpu.memory_space<vmem>>, vector<128x128xbf16>
    %cst_8 = arith.constant dense<0.000000e+00> : vector<256x128xf32>
    %10 = tpu.matmul %8, %9, %cst_8 {dimension_numbers = #tpu.dot_dimension_numbers<[1], [0], [0], [1], [0, 0, 1, 1], [], []>} : vector<256x128xbf16>, vector<128x128xbf16>, vector<256x128xf32> -> vector<256x128xf32>
    %c0_9 = arith.constant 0 : index
    %c0_10 = arith.constant 0 : index
    %11 = vector.load %arg5[%c0_9, %c0_10] : memref<128x128xbf16, #tpu.memory_space<vmem>>, vector<128x128xbf16>
    %cst_11 = arith.constant dense<0.000000e+00> : vector<256x128xf32>
    %12 = tpu.matmul %0, %11, %cst_11 {dimension_numbers = #tpu.dot_dimension_numbers<[1], [0], [0], [1], [0, 0, 1, 1], [], []>} : vector<256x128xbf16>, vector<128x128xbf16>, vector<256x128xf32> -> vector<256x128xf32>
    %13 = arith.addf %10, %12 : vector<256x128xf32>
    %c0_12 = arith.constant 0 : index
    %c0_13 = arith.constant 0 : index
    %14 = vector.load %arg6[%c0_12, %c0_13] : memref<1x128xf32, #tpu.memory_space<vmem>>, vector<1x128xf32>
    %15 = vector.broadcast %14 : vector<1x128xf32> to vector<256x128xf32>
    %16 = arith.addf %13, %15 : vector<256x128xf32>
    %cst_14 = arith.constant 0.000000e+00 : f32
    %17 = vector.broadcast %cst_14 : f32 to vector<256x128xf32>
    %18 = arith.maximumf %16, %17 : vector<256x128xf32>
    %c0_15 = arith.constant 0 : index
    %c0_16 = arith.constant 0 : index
    %19 = vector.load %arg7[%c0_15, %c0_16] : memref<256x128xf32, #tpu.memory_space<vmem>>, vector<256x128xf32>
    tpu.vector_store %arg7[%c0_15, %c0_16], %18 {strides = array<i32>} : memref<256x128xf32, #tpu.memory_space<vmem>>, vector<256x128xf32>,
    return
  }
  func.func @transform_0(%arg0: i32) -> (i32, i32) {
    %c0_i32 = arith.constant 0 : i32
    %c0_i32_0 = arith.constant 0 : i32
    return %arg0, %c0_i32 : i32, i32
  }
  func.func @transform_1(%arg0: i32) -> (i32, i32) {
    %c0_i32 = arith.constant 0 : i32
    %c0_i32_0 = arith.constant 0 : i32
    %c0_i32_1 = arith.constant 0 : i32
    return %c0_i32, %c0_i32_0 : i32, i32
  }
  func.func @transform_2(%arg0: i32) -> (i32, i32) {
    %c0_i32 = arith.constant 0 : i32
    %c0_i32_0 = arith.constant 0 : i32
    %c0_i32_1 = arith.constant 0 : i32
    return %c0_i32, %c0_i32_0 : i32, i32
  }
  func.func @transform_3(%arg0: i32) -> (i32, i32) {
    %c0_i32 = arith.constant 0 : i32
    %c0_i32_0 = arith.constant 0 : i32
    %c0_i32_1 = arith.constant 0 : i32
    return %c0_i32, %c0_i32_0 : i32, i32
  }
  func.func @transform_4(%arg0: i32) -> (i32, i32) {
    %c0_i32 = arith.constant 0 : i32
    %c0_i32_0 = arith.constant 0 : i32
    %c0_i32_1 = arith.constant 0 : i32
    return %c0_i32, %c0_i32_0 : i32, i32
  }
  func.func @transform_5(%arg0: i32) -> (i32, i32) {
    %c0_i32 = arith.constant 0 : i32
    %c0_i32_0 = arith.constant 0 : i32
    %c0_i32_1 = arith.constant 0 : i32
    return %c0_i32, %c0_i32_0 : i32, i32
  }
  func.func @transform_6(%arg0: i32) -> (i32, i32) {
    %c0_i32 = arith.constant 0 : i32
    %c0_i32_0 = arith.constant 0 : i32
    return %arg0, %c0_i32 : i32, i32
  }
}

</mosaic_0001>

<bundles_post_ra>
// kernel: tpu_custom_call.1
= control target key start
LH: loop header
LB: loop body
LE: loop exit
PB: predicated region body
PF: predicated region fallthrough
CT: control target
= control target key end

     0   :  { %11 = vsyncpa [#allocation3], 0  ;;  %s2126_s0 = inlined_call_operand.hbm [shape: bf16[512,128], index: 0, kind: input, shape index: {}]   ;;  %s2127_s1 = inlined_call_operand.hbm [shape: bf16[128,128], index: 1, kind: input, shape index: {}]   ;;  %s2128_s2 = inlined_call_operand.vmem [shape: f32[1,128], index: 2, kind: input, shape index: {}]   ;;  %s2129_s3 = inlined_call_operand.hbm [shape: bf16[128,128], index: 3, kind: input, shape index: {}]   ;;  %s2130_s4 = inlined_call_operand.hbm [shape: bf16[128,128], index: 4, kind: input, shape index: {}]   ;;  %s2131_s5 = inlined_call_operand.vmem [shape: f32[1,128], index: 5, kind: input, shape index: {}]   ;;  %s2132_s6 = inlined_call_operand.hbm [shape: f32[512,128], index: 6, kind: output, shape index: {}]  }
   0x1   :  { %13 = vsyncpa [#allocation3 + $0x1], 0 }
   0x2   :  { %14 = vsyncpa [#allocation6], 0 }
   0x3   :  { %15 = vsyncpa [#allocation9], 0 }
   0x4   :  { %16 = vsyncpa [#allocation4], 0 }
   0x5   :  { %18 = vsyncpa [#allocation4 + $0x1], 0  ;;  %s1748_s21 = smov 0   ;;  %s1750_s22 = smov 0  }
   0x6   :  { %s1752_s23 = smov 0   ;;  %s1754_s24 = smov 0  }
   0x7 LB: > { %s1769_s25 = sadd.s32 4294967295, %s1704_s24   ;;  %s1181_s26 = sadd.s32 4294967294, %s1704_s24   ;;  %s1704_s24 = sphi %s1754_s24, %s2147_s24   ;;  %s1700_s23 = sphi %s1752_s23, %s2146_s23   ;;  %s1696_s22 = sphi %s1750_s22, %s2145_s22   ;;  %s1692_s21 = sphi %s1748_s21, %s2144_s21  }
   0x8   : > { %p44_p0 = scmp.ne.s32.totalorder %s1696_s22, %s1692_s21  ;;  %p45_p1 = scmp.eq.s32.totalorder %s1769_s25, 0 }
   0x9   : > { %p173_p2 = scmp.eq.s32.totalorder %s1769_s25, 1  ;;  %p179_p3 = scmp.eq.s32.totalorder %s1181_s26, 1 }
   0xa   : > { %p1778_p4 = por %p45_p1, %p44_p0  ;;  %p1182_p5 = scmp.ge.s32.totalorder %s1704_s24, 1 }
   0xb   : > { %p1783_p6 = por %p179_p3, %p44_p0  ;;  %p186_p7 = scmp.lt.s32.totalorder %s1704_s24, 3 }
   0xc   : > { %s197_s7 = sshll.u32 %s2127_s1, 4  ;;  %s1706_s9 = smov [#allocation5]   ;;  %s198_s7 = int_to_ptr.hbm [resolvable:$true] %s197_s7 }
   0xd   : > { %p1791_p8 = pnand %p1182_p5, %p186_p7  ;;  %s199_s10 = sshll.u32 %s1706_s9, 4  ;;  %s200_s10 = int_to_ptr.vmem [resolvable:$true] %s199_s10 }
   0xe   : > { %s214_s14 = sshll.u32 %s2129_s3, 4  ;;  %s2133_s15 = smov 64   ;;  %s215_s14 = int_to_ptr.hbm [resolvable:$true] %s214_s14 }
   0xf   : > { %p1443_p9 = pneg %p1791_p8  ;;  %s2134_s16 = smov 4  }
  0x10   : > { %s1709_s17 = smov [#allocation7]   ;;  %s228_s26 = sshll.u32 %s2130_s4, 4  ;;  %s229_s26 = int_to_ptr.hbm [resolvable:$true] %s228_s26 }
  0x11   : > { %p1799_p10 = pnand %p1443_p9, %p45_p1  ;;  %s216_s18 = sshll.u32 %s1709_s17, 4  ;;  %s217_s18 = int_to_ptr.vmem [resolvable:$true] %s216_s18 }
  0x12   : > { %s1710_s29 = smov [#allocation8]   ;;  %p38_p13 = scmp.ne.s32.totalorder %s1700_s23, %s1696_s22 }
  0x13   : > { %1446 = dma.hbm_to_vmem [thread:$0]  (!%p1799_p10), %s198_s7, 1024, %s200_s10, [#allocation6], %s2133_s15, %s2133_s15, %s2134_s16  }
  0x14   : > { %1449 = dma.hbm_to_vmem [thread:$0]  (!%p1799_p10), %s215_s14, 1024, %s217_s18, [#allocation6], %s2133_s15, %s2133_s15, %s2134_s16  }
  0x15   : > { %s230_s30 = sshll.u32 %s1710_s29, 4  ;;  %s1821_s7 = sadd.s32 1, %s1704_s24   ;;  %s231_s30 = int_to_ptr.vmem [resolvable:$true] %s230_s30 }
  0x16   : > { %1452 = dma.hbm_to_vmem [thread:$0]  (!%p1799_p10), %s229_s26, 1024, %s231_s30, [#allocation9], %s2133_s15, %s2133_s15, %s2134_s16  }
  0x17   : > { %s28_s9 = ssub.s32 %s1704_s24, %s1821_s7  ;;  %s31_s10 = sadd.s32 1, %s1700_s23 }
  0x18   : > { %p29_p12 = scmp.eq.s32.totalorder %s28_s9, 0  ;;  %p39_p0 = scmp.eq.s32.totalorder %s1704_s24, 0 }
  0x19   : > { %p1839_p3 = por %p173_p2, %p38_p13  ;;  %p1464_p5 = scmp.lt.s32.totalorder %s1704_s24, 2 }
  0x1a   : > { %s1835_s12 = scalar_select %p29_p12, %s1700_s23, %s31_s10  }
  0x1b   : > { %s247_s14 = sand.u32 1, %s1700_s23   ;;  %s1361_s11 = sshll.u32 %s1704_s24, 7 }
  0x1c   : > { %p40_p7 = por %p39_p0, %p38_p13  ;;  %s1187_s17 = sshll.u32 %s247_s14, 7 }
  0x1d   : > { %s256_s20 = scalar_lea.hbm %s2126_s0, %s1361_s11  ;;  %s251_s29 = scalar_lea.vmem [#allocation2], %s1187_s17 }
  0x1e   : > { %s257_s26 = sshll.u32 %s256_s20, 4  ;;  %s259_s30 = sshll.u32 %s251_s29, 4  ;;  %s258_s26 = int_to_ptr.hbm [resolvable:$true] %s257_s26  ;;  %s260_s30 = int_to_ptr.vmem [resolvable:$true] %s259_s30 }
  0x1f   : > { %p1849_p9 = pnand %p1464_p5, %p40_p7  ;;  %s248_s10 = scalar_lea.sflag [#allocation3], %s247_s14 }
  0x20   : > { %s1600_s15 = sshra.s32 %s258_s26, 4  ;;  %s1607_s17 = scalar_lea.hbm %s2126_s0, 256  ;;  %s1601_s15 = int_to_ptr.hbm [resolvable:$true] %s1600_s15 }
  0x21   : > { %s1602_s16 = scalar_lea.hbm %s1601_s15, 128  ;;  %p1604_p10 = pneg %p1849_p9 }
  0x22   : > { %p1603_p2 = scmp.ne.s32.totalorder %s1601_s15, %s1602_s16  ;;  %p1608_p0 = scmp.lt.s32.totalorder %s1601_s15, %s2126_s0 }
  0x23   : > { %p1609_p5 = scmp.lt.s32.totalorder %s1607_s17, %s1602_s16 }
  0x24   : > { %p1605_p12 = pnand %p1604_p10, %p1603_p2 }
  0x25   : > { %p1610_p7 = por %p1609_p5, %p1608_p0 }
  0x26   : > { %p1606_p13 = pneg %p1605_p12 }
  0x28   : > { %p1611_p11 = pnand %p1610_p7, %p1606_p13 }
  0x2a   : > { %1614 = shalt.err (!%p1611_p11)
}
  0x2b   : > { %s2141_s14 = smov 4   ;;  %s2142_s29 = smov 64  }
  0x2c   : > { %1456 = dma.hbm_to_vmem [thread:$0]  (!%p1849_p9), %s258_s26, 2048, %s260_s30, %s248_s10, %s2142_s29, %s2142_s29, %s2141_s14  }
  0x2d   : > { %271 = sbr.rel (%p1791_p8) target bundleno = 553 (0x229), region = 44  ;;  %s1869_s11 = sand.u32 (!%p1791_p8), 1, %s1696_s22  }
  0x2e   : > { %s1191_s15 = sshll.u32 (!%p1791_p8), %s1869_s11, 7  ;;  %s274_s16 = scalar_lea.sflag (!%p1791_p8), [#allocation3], %s1869_s11 }
  0x2f   : > { %s1873_s18 = scalar_lea.vmem (!%p1791_p8), [#allocation2], %s1191_s15 }
  0x32   : > { %1675 = dma.done.wait (%p1778_p4), %s274_s16, 2048  }
  0x33   : > { %1677 = vsyncadd (%p1778_p4), %s274_s16, 4294965248 }
  0x34   : > { %1679 = dma.done.wait (%p45_p1), [#allocation6], 2048  }
  0x35   : > { %1681 = vsyncadd (%p45_p1), [#allocation6], 4294965248 }
  0x36   : > { %1683 = dma.done.wait (%p45_p1), [#allocation9], 1024  }
  0x37   : > { %1685 = vsyncadd (%p45_p1), [#allocation9], 4294966272  ;;  %v1385_v0 = vld [vmem:[#allocation5 + $0x38] sm:$0xff]  ;;  %v1384_v1 = vld [vmem:[#allocation5 + $0x30] sm:$0xff]  ;;  %s1195_s9 = sshll.u32 %s1869_s11, 8  ;;  %s1402_s17 = sshll.u32 %s1769_s25, 8 }
  0x38   : > { %520 = vmatpush.bf16.msra.mxu0 %v1385_v0  ;;  %1403 = vmatpush.bf16.msra.mxu3 %v1385_v0  ;;  %v1383_v2 = vld [vmem:[#allocation5 + $0x28] sm:$0xff]  ;;  %v1382_v3 = vld [vmem:[#allocation5 + $0x20] sm:$0xff]  ;;  %v1381_v4 = vld [vmem:[#allocation5 + $0x18] sm:$0xff]  ;;  %s2010_s10 = scalar_lea.vmem [#allocation10], %s1195_s9  ;;  %s1075_s14 = scalar_lea.hbm %s2132_s6, %s1402_s17 }
  0x39   : > { %v1380_v5 = vld [vmem:[#allocation5 + $0x10] sm:$0xff]  ;;  %v1379_v6 = vld [vmem:[#allocation5 + $0x8] sm:$0xff]  ;;  %v1378_v7 = vld [vmem:[#allocation5] sm:$0xff]  ;;  %s1076_s29 = sshll.u32 %s2010_s10, 4  ;;  %s1078_s15 = sshll.u32 %s1075_s14, 4  ;;  %s1077_s29 = int_to_ptr.vmem [resolvable:$true] %s1076_s29  ;;  %s1079_s15 = int_to_ptr.hbm [resolvable:$true] %s1078_s15 }
  0x3a   : > { %v1888_v8 = vld [vmem:[%s1873_s18] sm:$0xff]  ;;  %v1892_v9 = vld [vmem:[%s1873_s18 + $0x8] sm:$0xff]  ;;  %v1897_v11 = vld [vmem:[%s1873_s18 + $0x10] sm:$0xff]  ;;  %s1064_s16 = scalar_lea.sflag [#allocation4], %s1869_s11  ;;  %s1644_s25 = sshra.s32 %s1079_s15, 4  ;;  %s1645_s25 = int_to_ptr.hbm [resolvable:$true] %s1644_s25 }
  0x3b   : > { %v1374_v10 = vld [vmem:[%s1873_s18 + $0x60] sm:$0xff]  ;;  %v1375_v12 = vld [vmem:[%s1873_s18 + $0x68] sm:$0xff]  ;;  %v1902_v13 = vld [vmem:[%s1873_s18 + $0x18] sm:$0xff]  ;;  %s1650_s26 = scalar_lea.hbm %s2132_s6, 512  ;;  %p1651_p11 = scmp.lt.s32.totalorder %s1645_s25, %s2132_s6 }
  0x3c   : > { %521 = vmatpush.bf16.msra.mxu0 %v1384_v1  ;;  %1404 = vmatpush.bf16.msra.mxu3 %v1384_v1  ;;  %v1906_v14 = vld [vmem:[%s1873_s18 + $0x70] sm:$0xff]  ;;  %v1910_v15 = vld [vmem:[%s1873_s18 + $0x20] sm:$0xff]  ;;  %v1914_v16 = vld [vmem:[%s1873_s18 + $0x78] sm:$0xff] }
  0x3d   : > { %v1401_v17 = vld [vmem:[#allocation8 + $0x38] sm:$0xff]  ;;  %v1400_v19 = vld [vmem:[#allocation8 + $0x30] sm:$0xff]  ;;  %v1399_v20 = vld [vmem:[#allocation8 + $0x28] sm:$0xff] }
  0x3e   : > { %v1393_v18 = vld [vmem:[#allocation7 + $0x38] sm:$0xff]  ;;  %737 = vmatpush.bf16.msra.mxu1 %v1401_v17  ;;  %v1918_v21 = vld [vmem:[%s1873_s18 + $0x28] sm:$0xff]  ;;  %v1398_v22 = vld [vmem:[#allocation8 + $0x20] sm:$0xff] }
  0x3f   : > { %874 = vmatpush.bf16.msra.mxu2 %v1393_v18  ;;  %v1392_v23 = vld [vmem:[#allocation7 + $0x30] sm:$0xff]  ;;  %v1397_v24 = vld [vmem:[#allocation8 + $0x18] sm:$0xff]  ;;  %v1391_v25 = vld [vmem:[#allocation7 + $0x28] sm:$0xff] }
  0x40   : > { %522 = vmatpush.bf16.msra.mxu0 %v1383_v2  ;;  %1405 = vmatpush.bf16.msra.mxu3 %v1383_v2  ;;  %v1396_v26 = vld [vmem:[#allocation8 + $0x10] sm:$0xff]  ;;  %v1390_v27 = vld [vmem:[#allocation7 + $0x20] sm:$0xff]  ;;  %v1395_v28 = vld [vmem:[#allocation8 + $0x8] sm:$0xff] }
  0x41   : > { %v1389_v29 = vld [vmem:[#allocation7 + $0x18] sm:$0xff]  ;;  %v1922_v30 = vld [vmem:[%s1873_s18 + $0x30] sm:$0xff]  ;;  %v1394_v31 = vld [vmem:[#allocation8] sm:$0xff] }
  0x42   : > { %738 = vmatpush.bf16.msra.mxu1 %v1400_v19  ;;  %v1388_v32 = vld [vmem:[#allocation7 + $0x10] sm:$0xff]  ;;  %v1387_v33 = vld [vmem:[#allocation7 + $0x8] sm:$0xff]  ;;  %v1386_v34 = vld [vmem:[#allocation7] sm:$0xff] }
  0x43   : > { %875 = vmatpush.bf16.msra.mxu2 %v1392_v23  ;;  %v1927_v35 = vld [vmem:[%s1873_s18 + $0x38] sm:$0xff]  ;;  %v1932_v36 = vld [vmem:[%s1873_s18 + $0x40] sm:$0xff]  ;;  %v1945_v45 = vld [vmem:[%s1873_s18 + $0x48] sm:$0xff] }
  0x44   : > { %523 = vmatpush.bf16.msra.mxu0 %v1382_v3  ;;  %1406 = vmatpush.bf16.msra.mxu3 %v1382_v3  ;;  %v1937_v38 = vld [vmem:[%s2128_s2] ss:$0 sm:$0xff]  ;;  %v1954_v55 = vld [vmem:[%s1873_s18 + $0x50] sm:$0xff] }
  0x46   : > { %739 = vmatpush.bf16.msra.mxu1 %v1399_v20 }
  0x47   : > { %876 = vmatpush.bf16.msra.mxu2 %v1391_v25 }
  0x48   : > { %524 = vmatpush.bf16.msra.mxu0 %v1381_v4  ;;  %1407 = vmatpush.bf16.msra.mxu3 %v1381_v4 }
  0x4a   : > { %740 = vmatpush.bf16.msra.mxu1 %v1398_v22 }
  0x4b   : > { %877 = vmatpush.bf16.msra.mxu2 %v1390_v27 }
  0x4c   : > { %525 = vmatpush.bf16.msra.mxu0 %v1380_v5  ;;  %1408 = vmatpush.bf16.msra.mxu3 %v1380_v5 }
  0x4e   : > { %741 = vmatpush.bf16.msra.mxu1 %v1397_v24 }
  0x4f   : > { %878 = vmatpush.bf16.msra.mxu2 %v1389_v29 }
  0x50   : > { %526 = vmatpush.bf16.msra.mxu0 %v1379_v6  ;;  %1409 = vmatpush.bf16.msra.mxu3 %v1379_v6  ;;  %v1963_v6 = vld [vmem:[%s1873_s18 + $0x58] sm:$0xff]  ;;  %s1646_s18 = scalar_lea.hbm %s1645_s25, 256 }
  0x51   : > { %p1647_p1 = scmp.ne.s32.totalorder %s1645_s25, %s1646_s18  ;;  %p1652_p9 = scmp.lt.s32.totalorder %s1650_s26, %s1646_s18 }
  0x52   : > { %742 = vmatpush.bf16.msra.mxu1 %v1396_v26 }
  0x53   : > { %879 = vmatpush.bf16.msra.mxu2 %v1388_v32  ;;  %p1648_p4 = pnand %p1647_p1, %p1839_p3  ;;  %p1653_p2 = por %p1652_p9, %p1651_p11 }
  0x54   : > { %527 = vmatpush.bf16.msra.mxu0 %v1378_v7  ;;  %1410 = vmatpush.bf16.msra.mxu3 %v1378_v7 }
  0x55   : > { %p1649_p8 = pneg %p1648_p4 }
  0x56   : > { %743 = vmatpush.bf16.msra.mxu1 %v1395_v28 }
  0x57   : > { %528 = vmatmul.bf16.vlgmr.msra.gmra.mxu0 %v1888_v8  ;;  %588 = vmatmul.bf16.vlgmr.msra.gmra.mxu3 %v1374_v10  ;;  %p1654_p10 = pnand %p1653_p2, %p1649_p8 }
  0x58   : > { %1411 = vmatpush.bf16.msrb.mxu3 %v1401_v17  ;;  %880 = vmatpush.bf16.msra.mxu2 %v1387_v33 }
  0x5a   : > { %744 = vmatpush.bf16.msra.mxu1 %v1394_v31 }
  0x5c   : > { %1412 = vmatpush.bf16.msrb.mxu3 %v1400_v19  ;;  %881 = vmatpush.bf16.msra.mxu2 %v1386_v34 }
  0x5d   : > { %745 = vmatmul.bf16.vlgmr.msra.gmra.mxu1 %v1888_v8 }
  0x60   : > { %1413 = vmatpush.bf16.msrb.mxu3 %v1399_v20 }
  0x64   : > { %1414 = vmatpush.bf16.msrb.mxu3 %v1398_v22 }
  0x67   : > { %533 = vmatmul.bf16.gmra.mxu0 %v1892_v9  ;;  %593 = vmatmul.bf16.gmra.mxu3 %v1375_v12 }
  0x68   : > { %1415 = vmatpush.bf16.msrb.mxu3 %v1397_v24 }
  0x6c   : > { %1416 = vmatpush.bf16.msrb.mxu3 %v1396_v26 }
  0x6d   : > { %750 = vmatmul.bf16.gmra.mxu1 %v1892_v9 }
  0x70   : > { %1417 = vmatpush.bf16.msrb.mxu3 %v1395_v28 }
  0x74   : > { %1418 = vmatpush.bf16.msrb.mxu3 %v1394_v31 }
  0x77   : > { %538 = vmatmul.bf16.gmra.mxu0 %v1897_v11  ;;  %598 = vmatmul.bf16.gmra.mxu3 %v1906_v14 }
  0x78   : > { %1419 = vmatpush.bf16.msra.mxu3 %v1393_v18 }
  0x7c   : > { %1420 = vmatpush.bf16.msra.mxu3 %v1392_v23 }
  0x7d   : > { %755 = vmatmul.bf16.gmra.mxu1 %v1897_v11 }
  0x80   : > { %1421 = vmatpush.bf16.msra.mxu3 %v1391_v25 }
  0x84   : > { %1422 = vmatpush.bf16.msra.mxu3 %v1390_v27 }
  0x87   : > { %543 = vmatmul.bf16.gmra.mxu0 %v1902_v13  ;;  %603 = vmatmul.bf16.gmra.mxu3 %v1914_v16 }
  0x88   : > { %1423 = vmatpush.bf16.msra.mxu3 %v1389_v29 }
  0x8c   : > { %1424 = vmatpush.bf16.msra.mxu3 %v1388_v32 }
  0x8d   : > { %760 = vmatmul.bf16.gmra.mxu1 %v1902_v13 }
  0x90   : > { %1425 = vmatpush.bf16.msra.mxu3 %v1387_v33 }
  0x94   : > { %1426 = vmatpush.bf16.msra.mxu3 %v1386_v34 }
  0x97   : > { %548 = vmatmul.bf16.gmra.mxu0 %v1910_v15  ;;  %805 = vmatmul.bf16.vlgmr.msrb.gmra.mxu3 %v1374_v10 }
  0x9d   : > { %765 = vmatmul.bf16.gmra.mxu1 %v1910_v15 }
  0xa7   : > { %553 = vmatmul.bf16.gmra.mxu0 %v1918_v21  ;;  %810 = vmatmul.bf16.gmra.mxu3 %v1375_v12 }
  0xad   : > { %770 = vmatmul.bf16.gmra.mxu1 %v1918_v21 }
  0xb7   : > { %558 = vmatmul.bf16.gmra.mxu0 %v1922_v30  ;;  %815 = vmatmul.bf16.gmra.mxu3 %v1906_v14 }
  0xbd   : > { %775 = vmatmul.bf16.gmra.mxu1 %v1922_v30 }
  0xc7   : > { %563 = vmatmul.bf16.gmra.mxu0 %v1927_v35  ;;  %820 = vmatmul.bf16.gmra.mxu3 %v1914_v16 }
  0xcd   : > { %780 = vmatmul.bf16.gmra.mxu1 %v1927_v35 }
  0xd4   : > { %v529_v37 = vpop.f32.mrf.mxu0 }
  0xd5   : > { %v530_v39 = vadd.f32 %v1937_v38, %v529_v37 }
  0xd7   : > { %568 = vmatmul.bf16.gmra.mxu0 %v1932_v36  ;;  %v609_v42 = vmax.f32 %v530_v39, 0.0 }
  0xda   : > { %v589_v49 = vpop.f32.mrf.mxu3 }
  0xdb   : > { %v590_v54 = vadd.f32 %v1937_v38, %v589_v49 }
  0xdc   : > { %v531_v40 = vpop.f32.mrf.mxu0 }
  0xdd   : > { %v532_v41 = vadd.f32 %v1937_v38, %v531_v40  ;;  %v633_v58 = vmax.f32 %v590_v54, 0.0  ;;  %785 = vmatmul.bf16.gmra.mxu1 %v1932_v36 }
  0xdf   : > { %v610_v43 = vmax.f32 %v532_v41, 0.0 }
  0xe1   : > { %v641_v44 = vpack.c.bf16 %v610_v43, %v609_v42 }
  0xe2   : > { %v591_v57 = vpop.f32.mrf.mxu3 }
  0xe3   : > { %882 = vmatmul.bf16.vlgmr.msra.gmra.mxu2 %v641_v44  ;;  %v592_v59 = vadd.f32 %v1937_v38, %v591_v57 }
  0xe4   : > { %v534_v46 = vpop.f32.mrf.mxu0 }
  0xe5   : > { %v535_v47 = vadd.f32 %v1937_v38, %v534_v46  ;;  %v634_v60 = vmax.f32 %v592_v59, 0.0 }
  0xe7   : > { %573 = vmatmul.bf16.gmra.mxu0 %v1945_v45  ;;  %v611_v51 = vmax.f32 %v535_v47, 0.0  ;;  %v653_v61 = vpack.c.bf16 %v634_v60, %v633_v58 }
  0xe9   : > { %942 = vmatmul.bf16.vlgmr.msra.gmra.mxu3 %v653_v61 }
  0xea   : > { %v594_v0 = vpop.f32.mrf.mxu3 }
  0xeb   : > { %v595_v5 = vadd.f32 %v1937_v38, %v594_v0 }
  0xec   : > { %v536_v48 = vpop.f32.mrf.mxu0 }
  0xed   : > { %v537_v50 = vadd.f32 %v1937_v38, %v536_v48  ;;  %v635_v9 = vmax.f32 %v595_v5, 0.0  ;;  %790 = vmatmul.bf16.gmra.mxu1 %v1945_v45 }
  0xef   : > { %v612_v52 = vmax.f32 %v537_v50, 0.0 }
  0xf1   : > { %v642_v53 = vpack.c.bf16 %v612_v52, %v611_v51 }
  0xf2   : > { %v596_v8 = vpop.f32.mrf.mxu3 }
  0xf3   : > { %887 = vmatmul.bf16.gmra.mxu2 %v642_v53  ;;  %v597_v10 = vadd.f32 %v1937_v38, %v596_v8 }
  0xf4   : > { %v539_v56 = vpop.f32.mrf.mxu0 }
  0xf5   : > { %v540_v62 = vadd.f32 %v1937_v38, %v539_v56  ;;  %v636_v11 = vmax.f32 %v597_v10, 0.0  ;;  %v746_v56 = vpop.f32.mrf.mxu1 }
  0xf7   : > { %578 = vmatmul.bf16.gmra.mxu0 %v1954_v55  ;;  %v613_v2 = vmax.f32 %v540_v62, 0.0  ;;  %v654_v12 = vpack.c.bf16 %v636_v11, %v635_v9 }
  0xf9   : > { %947 = vmatmul.bf16.gmra.mxu3 %v654_v12 }
  0xfa   : > { %v599_v15 = vpop.f32.mrf.mxu3 }
  0xfb   : > { %v600_v20 = vadd.f32 %v1937_v38, %v599_v15 }
  0xfc   : > { %v541_v63 = vpop.f32.mrf.mxu0 }
  0xfd   : > { %v542_v1 = vadd.f32 %v1937_v38, %v541_v63  ;;  %v637_v24 = vmax.f32 %v600_v20, 0.0  ;;  %v748_v61 = vpop.f32.mrf.mxu1  ;;  %795 = vmatmul.bf16.gmra.mxu1 %v1954_v55 }
  0xff   : > { %v614_v3 = vmax.f32 %v542_v1, 0.0 }
 0x101   : > { %v643_v4 = vpack.c.bf16 %v614_v3, %v613_v2 }
 0x102   : > { %v601_v23 = vpop.f32.mrf.mxu3 }
 0x103   : > { %892 = vmatmul.bf16.gmra.mxu2 %v643_v4  ;;  %v602_v25 = vadd.f32 %v1937_v38, %v601_v23 }
 0x104   : > { %v544_v7 = vpop.f32.mrf.mxu0 }
 0x105   : > { %v545_v13 = vadd.f32 %v1937_v38, %v544_v7  ;;  %v638_v26 = vmax.f32 %v602_v25, 0.0  ;;  %v751_v1 = vpop.f32.mrf.mxu1 }
 0x107   : > { %583 = vmatmul.bf16.gmra.mxu0 %v1963_v6  ;;  %v615_v17 = vmax.f32 %v545_v13, 0.0  ;;  %v655_v27 = vpack.c.bf16 %v638_v26, %v637_v24 }
 0x109   : > { %952 = vmatmul.bf16.gmra.mxu3 %v655_v27 }
 0x10a   : > { %v604_v21 = vpop.f32.mrf.mxu3 }
 0x10b   : > { %v605_v37 = vadd.f32 %v1937_v38, %v604_v21 }
 0x10c   : > { %v546_v14 = vpop.f32.mrf.mxu0 }
 0x10d   : > { %v547_v16 = vadd.f32 %v1937_v38, %v546_v14  ;;  %v639_v41 = vmax.f32 %v605_v37, 0.0  ;;  %v753_v8 = vpop.f32.mrf.mxu1  ;;  %800 = vmatmul.bf16.gmra.mxu1 %v1963_v6 }
 0x10f   : > { %v616_v18 = vmax.f32 %v547_v16, 0.0 }
 0x111   : > { %v644_v19 = vpack.c.bf16 %v616_v18, %v615_v17  ;;  %v2002_v18 = vld [vmem:[%s2131_s5] ss:$0 sm:$0xff] }
 0x112   : > { %v606_v40 = vpop.f32.mrf.mxu3 }
 0x113   : > { %897 = vmatmul.bf16.gmra.mxu2 %v644_v19  ;;  %v607_v42 = vadd.f32 %v1937_v38, %v606_v40 }
 0x114   : > { %v549_v22 = vpop.f32.mrf.mxu0 }
 0x115   : > { %v550_v28 = vadd.f32 %v1937_v38, %v549_v22  ;;  %v640_v43 = vmax.f32 %v607_v42, 0.0  ;;  %v756_v15 = vpop.f32.mrf.mxu1 }
 0x117   : > { %v617_v32 = vmax.f32 %v550_v28, 0.0  ;;  %v656_v44 = vpack.c.bf16 %v640_v43, %v639_v41 }
 0x119   : > { %957 = vmatmul.bf16.gmra.mxu3 %v656_v44 }
 0x11a   : > { %v1983_v57 = vpop.f32.mrf.mxu3 }
 0x11c   : > { %v551_v29 = vpop.f32.mrf.mxu0 }
 0x11d   : > { %v552_v31 = vadd.f32 %v1937_v38, %v551_v29  ;;  %v758_v23 = vpop.f32.mrf.mxu1 }
 0x11f   : > { %v618_v33 = vmax.f32 %v552_v31, 0.0 }
 0x121   : > { %v645_v34 = vpack.c.bf16 %v618_v33, %v617_v32 }
 0x122   : > { %v1985_v62 = vpop.f32.mrf.mxu3 }
 0x123   : > { %902 = vmatmul.bf16.gmra.mxu2 %v645_v34 }
 0x124   : > { %v554_v39 = vpop.f32.mrf.mxu0 }
 0x125   : > { %v555_v46 = vadd.f32 %v1937_v38, %v554_v39  ;;  %v761_v39 = vpop.f32.mrf.mxu1 }
 0x127   : > { %v619_v48 = vmax.f32 %v555_v46, 0.0 }
 0x12a   : > { %v1990_v2 = vpop.f32.mrf.mxu3 }
 0x12c   : > { %v556_v47 = vpop.f32.mrf.mxu0 }
 0x12d   : > { %v557_v30 = vadd.f32 %v1937_v38, %v556_v47 }
 0x12f   : > { %v620_v49 = vmax.f32 %v557_v30, 0.0 }
 0x131   : > { %v646_v50 = vpack.c.bf16 %v620_v49, %v619_v48  ;;  %v763_v49 = vpop.f32.mrf.mxu1 }
 0x132   : > { %v1992_v9 = vpop.f32.mrf.mxu3 }
 0x133   : > { %907 = vmatmul.bf16.gmra.mxu2 %v646_v50 }
 0x134   : > { %v559_v51 = vpop.f32.mrf.mxu0 }
 0x135   : > { %v560_v52 = vadd.f32 %v1937_v38, %v559_v51 }
 0x137   : > { %v621_v58 = vmax.f32 %v560_v52, 0.0 }
 0x13a   : > { %v1997_v12 = vpop.f32.mrf.mxu3 }
 0x13c   : > { %v561_v53 = vpop.f32.mrf.mxu0 }
 0x13d   : > { %v562_v54 = vadd.f32 %v1937_v38, %v561_v53 }
 0x13f   : > { %v622_v59 = vmax.f32 %v562_v54, 0.0 }
 0x141   : > { %v647_v35 = vpack.c.bf16 %v622_v59, %v621_v58 }
 0x142   : > { %v2005_v22 = vpop.f32.mrf.mxu3 }
 0x143   : > { %912 = vmatmul.bf16.gmra.mxu2 %v647_v35 }
 0x144   : > { %v564_v60 = vpop.f32.mrf.mxu0 }
 0x145   : > { %v565_v63 = vadd.f32 %v1937_v38, %v564_v60 }
 0x147   : > { %v623_v3 = vmax.f32 %v565_v63, 0.0 }
 0x14a   : > { %v2014_v32 = vpop.f32.mrf.mxu3 }
 0x14c   : > { %v566_v0 = vpop.f32.mrf.mxu0 }
 0x14d   : > { %v567_v36 = vadd.f32 %v1937_v38, %v566_v0 }
 0x14f   : > { %v624_v4 = vmax.f32 %v567_v36, 0.0  ;;  %v766_v36 = vpop.f32.mrf.mxu1 }
 0x151   : > { %v648_v5 = vpack.c.bf16 %v624_v4, %v623_v3 }
 0x152   : > { %v2018_v42 = vpop.f32.mrf.mxu3 }
 0x153   : > { %917 = vmatmul.bf16.gmra.mxu2 %v648_v5 }
 0x154   : > { %v569_v7 = vpop.f32.mrf.mxu0 }
 0x155   : > { %v570_v10 = vadd.f32 %v1937_v38, %v569_v7 }
 0x157   : > { %v625_v13 = vmax.f32 %v570_v10, 0.0 }
 0x15c   : > { %v571_v11 = vpop.f32.mrf.mxu0 }
 0x15d   : > { %v572_v45 = vadd.f32 %v1937_v38, %v571_v11 }
 0x15f   : > { %v626_v14 = vmax.f32 %v572_v45, 0.0 }
 0x161   : > { %v649_v16 = vpack.c.bf16 %v626_v14, %v625_v13 }
 0x163   : > { %922 = vmatmul.bf16.gmra.mxu2 %v649_v16 }
 0x164   : > { %v574_v17 = vpop.f32.mrf.mxu0 }
 0x165   : > { %v575_v24 = vadd.f32 %v1937_v38, %v574_v17 }
 0x166   : > { %v883_v19 = vpop.f32.mrf.mxu2 }
 0x167   : > { %v884_v20 = vadd.f32 %v883_v19, %v746_v56  ;;  %v627_v29 = vmax.f32 %v575_v24, 0.0  ;;  %v768_v19 = vpop.f32.mrf.mxu1 }
 0x169   : > { %v967_v55 = vadd.f32 %v2002_v18, %v884_v20 }
 0x16b   : > { %v999_v25 = vmax.f32 %v967_v55, 0.0 }
 0x16c   : > { %v576_v26 = vpop.f32.mrf.mxu0  ;;  %v943_v53 = vpop.f32.mrf.mxu3 }
 0x16d   : > { %1031 = vst [vmem:[%s2010_s10] sm:$0xff] %v999_v25  ;;  %v577_v27 = vadd.f32 %v1937_v38, %v576_v26  ;;  %v944_v35 = vadd.f32 %v943_v53, %v1983_v57 }
 0x16e   : > { %v885_v28 = vpop.f32.mrf.mxu2 }
 0x16f   : > { %v628_v21 = vmax.f32 %v577_v27, 0.0  ;;  %v886_v31 = vadd.f32 %v885_v28, %v748_v61  ;;  %v991_v63 = vadd.f32 %v2002_v18, %v944_v35 }
 0x171   : > { %v968_v33 = vadd.f32 %v2002_v18, %v886_v31  ;;  %v650_v34 = vpack.c.bf16 %v628_v21, %v627_v29  ;;  %v1023_v4 = vmax.f32 %v991_v63, 0.0  ;;  %v771_v31 = vpop.f32.mrf.mxu1 }
 0x173   : > { %v1000_v37 = vmax.f32 %v968_v33, 0.0  ;;  %927 = vmatmul.bf16.gmra.mxu2 %v650_v34  ;;  %1055 = vst [vmem:[%s2010_s10 + $0xc0] sm:$0xff] %v1023_v4 }
 0x174   : > { %v579_v6 = vpop.f32.mrf.mxu0  ;;  %v945_v0 = vpop.f32.mrf.mxu3 }
 0x175   : > { %1032 = vst [vmem:[%s2010_s10 + $0x8] sm:$0xff] %v1000_v37  ;;  %v580_v44 = vadd.f32 %v1937_v38, %v579_v6 }
 0x176   : > { %v888_v40 = vpop.f32.mrf.mxu2 }
 0x177   : > { %v889_v41 = vadd.f32 %v888_v40, %v751_v1  ;;  %v629_v50 = vmax.f32 %v580_v44, 0.0  ;;  %v946_v1 = vadd.f32 %v945_v0, %v1985_v62 }
 0x179   : > { %v969_v43 = vadd.f32 %v2002_v18, %v889_v41  ;;  %v992_v5 = vadd.f32 %v2002_v18, %v946_v1  ;;  %v773_v41 = vpop.f32.mrf.mxu1 }
 0x17b   : > { %v1001_v46 = vmax.f32 %v969_v43, 0.0  ;;  %v1024_v10 = vmax.f32 %v992_v5, 0.0 }
 0x17c   : > { %v581_v47 = vpop.f32.mrf.mxu0 }
 0x17d   : > { %1033 = vst [vmem:[%s2010_s10 + $0x10] sm:$0xff] %v1001_v46  ;;  %v582_v30 = vadd.f32 %v1937_v38, %v581_v47 }
 0x17e   : > { %v890_v48 = vpop.f32.mrf.mxu2  ;;  %1056 = vst [vmem:[%s2010_s10 + $0xc8] sm:$0xff] %v1024_v10 }
 0x17f   : > { %v630_v51 = vmax.f32 %v582_v30, 0.0  ;;  %v891_v52 = vadd.f32 %v890_v48, %v753_v8 }
 0x181   : > { %v970_v54 = vadd.f32 %v2002_v18, %v891_v52  ;;  %v651_v56 = vpack.c.bf16 %v630_v51, %v629_v50 }
 0x183   : > { %v1002_v58 = vmax.f32 %v970_v54, 0.0  ;;  %932 = vmatmul.bf16.gmra.mxu2 %v651_v56  ;;  %v776_v54 = vpop.f32.mrf.mxu1 }
 0x184   : > { %v584_v59 = vpop.f32.mrf.mxu0 }
 0x185   : > { %1034 = vst [vmem:[%s2010_s10 + $0x18] sm:$0xff] %v1002_v58  ;;  %v585_v7 = vadd.f32 %v1937_v38, %v584_v59 }
 0x186   : > { %v893_v60 = vpop.f32.mrf.mxu2 }
 0x187   : > { %v894_v61 = vadd.f32 %v893_v60, %v756_v15  ;;  %v631_v13 = vmax.f32 %v585_v7, 0.0  ;;  %v948_v15 = vpop.f32.mrf.mxu3 }
 0x188   : > { %v949_v55 = vadd.f32 %v948_v15, %v1990_v2 }
 0x189   : > { %v971_v3 = vadd.f32 %v2002_v18, %v894_v61 }
 0x18a   : > { %v993_v25 = vadd.f32 %v2002_v18, %v949_v55 }
 0x18b   : > { %v1003_v8 = vmax.f32 %v971_v3, 0.0  ;;  %v778_v1 = vpop.f32.mrf.mxu1 }
 0x18c   : > { %v586_v57 = vpop.f32.mrf.mxu0  ;;  %v1025_v28 = vmax.f32 %v993_v25, 0.0 }
 0x18d   : > { %1035 = vst [vmem:[%s2010_s10 + $0x20] sm:$0xff] %v1003_v8  ;;  %v587_v11 = vadd.f32 %v1937_v38, %v586_v57 }
 0x18e   : > { %v895_v45 = vpop.f32.mrf.mxu2  ;;  %1057 = vst [vmem:[%s2010_s10 + $0xd0] sm:$0xff] %v1025_v28 }
 0x18f   : > { %v632_v14 = vmax.f32 %v587_v11, 0.0  ;;  %v896_v62 = vadd.f32 %v895_v45, %v758_v23  ;;  %v950_v26 = vpop.f32.mrf.mxu3 }
 0x190   : > { %v951_v23 = vadd.f32 %v950_v26, %v1992_v9 }
 0x191   : > { %v972_v16 = vadd.f32 %v2002_v18, %v896_v62  ;;  %v652_v17 = vpack.c.bf16 %v632_v14, %v631_v13 }
 0x192   : > { %v994_v29 = vadd.f32 %v2002_v18, %v951_v23 }
 0x193   : > { %v1004_v20 = vmax.f32 %v972_v16, 0.0  ;;  %937 = vmatmul.bf16.gmra.mxu2 %v652_v17  ;;  %v781_v10 = vpop.f32.mrf.mxu1 }
 0x194   : > { %v1026_v33 = vmax.f32 %v994_v29, 0.0 }
 0x195   : > { %1036 = vst [vmem:[%s2010_s10 + $0x28] sm:$0xff] %v1004_v20 }
 0x196   : > { %v898_v24 = vpop.f32.mrf.mxu2  ;;  %1058 = vst [vmem:[%s2010_s10 + $0xd8] sm:$0xff] %v1026_v33 }
 0x197   : > { %v899_v38 = vadd.f32 %v898_v24, %v761_v39  ;;  %v953_v37 = vpop.f32.mrf.mxu3 }
 0x198   : > { %v954_v9 = vadd.f32 %v953_v37, %v1997_v12 }
 0x199   : > { %v973_v27 = vadd.f32 %v2002_v18, %v899_v38 }
 0x19a   : > { %v995_v44 = vadd.f32 %v2002_v18, %v954_v9 }
 0x19b   : > { %v1005_v21 = vmax.f32 %v973_v27, 0.0  ;;  %v783_v62 = vpop.f32.mrf.mxu1 }
 0x19c   : > { %v1027_v48 = vmax.f32 %v995_v44, 0.0 }
 0x19d   : > { %1037 = vst [vmem:[%s2010_s10 + $0x30] sm:$0xff] %v1005_v21 }
 0x19e   : > { %v900_v34 = vpop.f32.mrf.mxu2  ;;  %1059 = vst [vmem:[%s2010_s10 + $0xe0] sm:$0xff] %v1027_v48 }
 0x19f   : > { %v901_v2 = vadd.f32 %v900_v34, %v763_v49  ;;  %v955_v46 = vpop.f32.mrf.mxu3 }
 0x1a0   : > { %v956_v47 = vadd.f32 %v955_v46, %v2005_v22 }
 0x1a1   : > { %v974_v6 = vadd.f32 %v2002_v18, %v901_v2 }
 0x1a2   : > { %v996_v49 = vadd.f32 %v2002_v18, %v956_v47 }
 0x1a3   : > { %v1006_v39 = vmax.f32 %v974_v6, 0.0  ;;  %v786_v55 = vpop.f32.mrf.mxu1 }
 0x1a4   : > { %v1028_v51 = vmax.f32 %v996_v49, 0.0 }
 0x1a5   : > { %1038 = vst [vmem:[%s2010_s10 + $0x38] sm:$0xff] %v1006_v39 }
 0x1a6   : > { %v903_v40 = vpop.f32.mrf.mxu2  ;;  %1060 = vst [vmem:[%s2010_s10 + $0xe8] sm:$0xff] %v1028_v51 }
 0x1a7   : > { %v904_v43 = vadd.f32 %v903_v40, %v766_v36  ;;  %v958_v53 = vpop.f32.mrf.mxu3 }
 0x1a8   : > { %v959_v22 = vadd.f32 %v958_v53, %v2014_v32 }
 0x1a9   : > { %v975_v30 = vadd.f32 %v2002_v18, %v904_v43 }
 0x1aa   : > { %v997_v60 = vadd.f32 %v2002_v18, %v959_v22 }
 0x1ab   : > { %v1007_v50 = vmax.f32 %v975_v30, 0.0  ;;  %v788_v27 = vpop.f32.mrf.mxu1 }
 0x1ac   : > { %v1029_v36 = vmax.f32 %v997_v60, 0.0 }
 0x1ad   : > { %1039 = vst [vmem:[%s2010_s10 + $0x40] sm:$0xff] %v1007_v50 }
 0x1ae   : > { %v905_v52 = vpop.f32.mrf.mxu2  ;;  %1061 = vst [vmem:[%s2010_s10 + $0xf0] sm:$0xff] %v1029_v36 }
 0x1af   : > { %v906_v12 = vadd.f32 %v905_v52, %v768_v19  ;;  %v960_v61 = vpop.f32.mrf.mxu3 }
 0x1b0   : > { %v961_v63 = vadd.f32 %v960_v61, %v2018_v42 }
 0x1b1   : > { %v976_v56 = vadd.f32 %v2002_v18, %v906_v12 }
 0x1b2   : > { %v998_v3 = vadd.f32 %v2002_v18, %v961_v63 }
 0x1b3   : > { %v1008_v58 = vmax.f32 %v976_v56, 0.0  ;;  %v791_v34 = vpop.f32.mrf.mxu1 }
 0x1b4   : > { %v1030_v5 = vmax.f32 %v998_v3, 0.0 }
 0x1b5   : > { %1040 = vst [vmem:[%s2010_s10 + $0x48] sm:$0xff] %v1008_v58 }
 0x1b6   : > { %v908_v59 = vpop.f32.mrf.mxu2  ;;  %1062 = vst [vmem:[%s2010_s10 + $0xf8] sm:$0xff] %v1030_v5 }
 0x1b7   : > { %v909_v35 = vadd.f32 %v908_v59, %v771_v31 }
 0x1b9   : > { %v977_v0 = vadd.f32 %v2002_v18, %v909_v35 }
 0x1bb   : > { %v1009_v4 = vmax.f32 %v977_v0, 0.0  ;;  %v793_v9 = vpop.f32.mrf.mxu1 }
 0x1bd   : > { %1041 = vst [vmem:[%s2010_s10 + $0x50] sm:$0xff] %v1009_v4 }
 0x1be   : > { %v910_v32 = vpop.f32.mrf.mxu2 }
 0x1bf   : > { %v911_v7 = vadd.f32 %v910_v32, %v773_v41 }
 0x1c1   : > { %v978_v8 = vadd.f32 %v2002_v18, %v911_v7 }
 0x1c3   : > { %v1010_v57 = vmax.f32 %v978_v8, 0.0  ;;  %v796_v30 = vpop.f32.mrf.mxu1 }
 0x1c5   : > { %1042 = vst [vmem:[%s2010_s10 + $0x58] sm:$0xff] %v1010_v57 }
 0x1c6   : > { %v913_v42 = vpop.f32.mrf.mxu2 }
 0x1c7   : > { %v914_v11 = vadd.f32 %v913_v42, %v776_v54 }
 0x1c9   : > { %v979_v45 = vadd.f32 %v2002_v18, %v914_v11 }
 0x1cb   : > { %v1011_v13 = vmax.f32 %v979_v45, 0.0  ;;  %v798_v12 = vpop.f32.mrf.mxu1 }
 0x1cd   : > { %1043 = vst [vmem:[%s2010_s10 + $0x60] sm:$0xff] %v1011_v13 }
 0x1ce   : > { %v915_v14 = vpop.f32.mrf.mxu2 }
 0x1cf   : > { %v916_v15 = vadd.f32 %v915_v14, %v778_v1 }
 0x1d1   : > { %v980_v16 = vadd.f32 %v2002_v18, %v916_v15 }
 0x1d3   : > { %v1012_v17 = vmax.f32 %v980_v16, 0.0  ;;  %v801_v59 = vpop.f32.mrf.mxu1 }
 0x1d5   : > { %1044 = vst [vmem:[%s2010_s10 + $0x68] sm:$0xff] %v1012_v17 }
 0x1d6   : > { %v918_v19 = vpop.f32.mrf.mxu2 }
 0x1d7   : > { %v919_v20 = vadd.f32 %v918_v19, %v781_v10 }
 0x1d9   : > { %v981_v24 = vadd.f32 %v2002_v18, %v919_v20 }
 0x1db   : > { %v1013_v38 = vmax.f32 %v981_v24, 0.0  ;;  %v803_v0 = vpop.f32.mrf.mxu1 }
 0x1dd   : > { %1045 = vst [vmem:[%s2010_s10 + $0x70] sm:$0xff] %v1013_v38 }
 0x1de   : > { %v920_v25 = vpop.f32.mrf.mxu2 }
 0x1df   : > { %v921_v26 = vadd.f32 %v920_v25, %v783_v62 }
 0x1e1   : > { %v982_v23 = vadd.f32 %v2002_v18, %v921_v26 }
 0x1e3   : > { %v1014_v28 = vmax.f32 %v982_v23, 0.0 }
 0x1e5   : > { %1046 = vst [vmem:[%s2010_s10 + $0x78] sm:$0xff] %v1014_v28 }
 0x1e6   : > { %v923_v29 = vpop.f32.mrf.mxu2 }
 0x1e7   : > { %v924_v21 = vadd.f32 %v923_v29, %v786_v55 }
 0x1e9   : > { %v983_v31 = vadd.f32 %v2002_v18, %v924_v21 }
 0x1eb   : > { %v1015_v33 = vmax.f32 %v983_v31, 0.0 }
 0x1ed   : > { %1047 = vst [vmem:[%s2010_s10 + $0x80] sm:$0xff] %v1015_v33 }
 0x1ee   : > { %v925_v2 = vpop.f32.mrf.mxu2 }
 0x1ef   : > { %v926_v37 = vadd.f32 %v925_v2, %v788_v27 }
 0x1f1   : > { %v984_v6 = vadd.f32 %v2002_v18, %v926_v37 }
 0x1f3   : > { %v1016_v39 = vmax.f32 %v984_v6, 0.0 }
 0x1f5   : > { %1048 = vst [vmem:[%s2010_s10 + $0x88] sm:$0xff] %v1016_v39 }
 0x1f6   : > { %v928_v40 = vpop.f32.mrf.mxu2 }
 0x1f7   : > { %v929_v41 = vadd.f32 %v928_v40, %v791_v34 }
 0x1f9   : > { %v985_v43 = vadd.f32 %v2002_v18, %v929_v41 }
 0x1fb   : > { %v1017_v44 = vmax.f32 %v985_v43, 0.0 }
 0x1fd   : > { %1049 = vst [vmem:[%s2010_s10 + $0x90] sm:$0xff] %v1017_v44 }
 0x1fe   : > { %v930_v46 = vpop.f32.mrf.mxu2 }
 0x1ff   : > { %v931_v47 = vadd.f32 %v930_v46, %v793_v9 }
 0x201   : > { %v986_v48 = vadd.f32 %v2002_v18, %v931_v47 }
 0x203   : > { %v1018_v49 = vmax.f32 %v986_v48, 0.0 }
 0x205   : > { %1050 = vst [vmem:[%s2010_s10 + $0x98] sm:$0xff] %v1018_v49 }
 0x206   : > { %v933_v50 = vpop.f32.mrf.mxu2 }
 0x207   : > { %v934_v51 = vadd.f32 %v933_v50, %v796_v30 }
 0x209   : > { %v987_v52 = vadd.f32 %v2002_v18, %v934_v51 }
 0x20b   : > { %v1019_v53 = vmax.f32 %v987_v52, 0.0 }
 0x20d   : > { %1051 = vst [vmem:[%s2010_s10 + $0xa0] sm:$0xff] %v1019_v53 }
 0x20e   : > { %v935_v54 = vpop.f32.mrf.mxu2 }
 0x20f   : > { %v936_v56 = vadd.f32 %v935_v54, %v798_v12 }
 0x211   : > { %v988_v58 = vadd.f32 %v2002_v18, %v936_v56 }
 0x213   : > { %v1020_v22 = vmax.f32 %v988_v58, 0.0 }
 0x215   : > { %1052 = vst [vmem:[%s2010_s10 + $0xa8] sm:$0xff] %v1020_v22 }
 0x216   : > { %v938_v35 = vpop.f32.mrf.mxu2 }
 0x217   : > { %v939_v60 = vadd.f32 %v938_v35, %v801_v59 }
 0x219   : > { %v989_v61 = vadd.f32 %v2002_v18, %v939_v60 }
 0x21b   : > { %v1021_v63 = vmax.f32 %v989_v61, 0.0 }
 0x21d   : > { %1053 = vst [vmem:[%s2010_s10 + $0xb0] sm:$0xff] %v1021_v63 }
 0x21e   : > { %v940_v36 = vpop.f32.mrf.mxu2 }
 0x21f   : > { %v941_v1 = vadd.f32 %v940_v36, %v803_v0 }
 0x221   : > { %v990_v3 = vadd.f32 %v2002_v18, %v941_v1 }
 0x223   : > { %v1022_v4 = vmax.f32 %v990_v3, 0.0 }
 0x225   : > { %1054 = vst [vmem:[%s2010_s10 + $0xb8] sm:$0xff] %v1022_v4 }
 0x226   : > { %1657 = shalt.err (!%p1654_p10)
}
 0x227   : > { %s1711_s11 = smov 128   ;;  %s1712_s10 = smov 8  }
 0x228   : > { %1441 = dma.vmem_to_hbm [thread:$0]  (%p1839_p3), %s1077_s29, 4096, %s1079_s15, %s1064_s16, %s1711_s11, %s1711_s11, %s1712_s10  }
 0x229 PF: > { %s1093_s17 = sand.u32 1, %s1692_s21   ;;  %p2143_p12 = scmp.ge.s32.totalorder %s1704_s24, 2 }
 0x22a   : > { %s1094_s19 = scalar_lea.sflag [#allocation4], %s1093_s17 }
 0x22b   : > { %p1458_p13 = pnand %p2143_p12, %p1783_p6 }
 0x22d   : > { %p1459_p0 = pneg %p1458_p13 }
 0x22f   : > { %1687 = dma.done.wait (%p1459_p0), %s1094_s19, 4096  }
 0x230   : > { %1689 = vsyncadd (%p1459_p0), %s1094_s19, 4294963200  ;;  %p21_p5 = scmp.ge.s32.totalorder %s1821_s7, 4   ;;  %s2144_s21 = smov %s1696_s22 }
 0x231   : > { %s2145_s22 = smov %s1700_s23  ;;  %s2146_s23 = smov %s1835_s12 }
 0x232   : > { %s2147_s24 = smov %s1821_s7  ;;  %23 = sbr.rel (!%p21_p5) target bundleno = 7 (0x7), region = 101 }
 0x237   :  { %1100 = vsyncpa [#allocation3], 1 }
 0x238   :  { %1102 = vsyncpa [#allocation3 + $0x1], 1 }
 0x239   :  { %1103 = vsyncpa [#allocation6], 1 }
 0x23a   :  { %1104 = vsyncpa [#allocation9], 1 }
 0x23b   :  { %1105 = vsyncpa [#allocation4], 1 }
 0x23c   :  { %1107 = vsyncpa [#allocation4 + $0x1], 1 }

// kernel: tpu_custom_call.1
= control target key start
LH: loop header
LB: loop body
LE: loop exit
PB: predicated region body
PF: predicated region fallthrough
CT: control target
= control target key end

     0   :  { %11 = vsyncpa [#allocation3], 0  ;;  %s2126_s0 = inlined_call_operand.hbm [shape: bf16[512,128], index: 0, kind: input, shape index: {}]   ;;  %s2127_s1 = inlined_call_operand.hbm [shape: bf16[128,128], index: 1, kind: input, shape index: {}]   ;;  %s2128_s2 = inlined_call_operand.vmem [shape: f32[1,128], index: 2, kind: input, shape index: {}]   ;;  %s2129_s3 = inlined_call_operand.hbm [shape: bf16[128,128], index: 3, kind: input, shape index: {}]   ;;  %s2130_s4 = inlined_call_operand.hbm [shape: bf16[128,128], index: 4, kind: input, shape index: {}]   ;;  %s2131_s5 = inlined_call_operand.vmem [shape: f32[1,128], index: 5, kind: input, shape index: {}]   ;;  %s2132_s6 = inlined_call_operand.hbm [shape: f32[512,128], index: 6, kind: output, shape index: {}]  }
   0x1   :  { %13 = vsyncpa [#allocation3 + $0x1], 0 }
   0x2   :  { %14 = vsyncpa [#allocation6], 0 }
   0x3   :  { %15 = vsyncpa [#allocation9], 0 }
   0x4   :  { %16 = vsyncpa [#allocation4], 0 }
   0x5   :  { %18 = vsyncpa [#allocation4 + $0x1], 0  ;;  %s1748_s21 = smov 0   ;;  %s1750_s22 = smov 0  }
   0x6   :  { %s1752_s23 = smov 0   ;;  %s1754_s24 = smov 0  }
   0x7 LB: > { %s1769_s25 = sadd.s32 4294967295, %s1704_s24   ;;  %s1181_s26 = sadd.s32 4294967294, %s1704_s24   ;;  %s1704_s24 = sphi %s1754_s24, %s2147_s24   ;;  %s1700_s23 = sphi %s1752_s23, %s2146_s23   ;;  %s1696_s22 = sphi %s1750_s22, %s2145_s22   ;;  %s1692_s21 = sphi %s1748_s21, %s2144_s21  }
   0x8   : > { %p44_p0 = scmp.ne.s32.totalorder %s1696_s22, %s1692_s21  ;;  %p45_p1 = scmp.eq.s32.totalorder %s1769_s25, 0 }
   0x9   : > { %p173_p2 = scmp.eq.s32.totalorder %s1769_s25, 1  ;;  %p179_p3 = scmp.eq.s32.totalorder %s1181_s26, 1 }
   0xa   : > { %p1778_p4 = por %p45_p1, %p44_p0  ;;  %p1182_p5 = scmp.ge.s32.totalorder %s1704_s24, 1 }
   0xb   : > { %p1783_p6 = por %p179_p3, %p44_p0  ;;  %p186_p7 = scmp.lt.s32.totalorder %s1704_s24, 3 }
   0xc   : > { %s197_s7 = sshll.u32 %s2127_s1, 4  ;;  %s1706_s9 = smov [#allocation5]   ;;  %s198_s7 = int_to_ptr.hbm [resolvable:$true] %s197_s7 }
   0xd   : > { %p1791_p8 = pnand %p1182_p5, %p186_p7  ;;  %s199_s10 = sshll.u32 %s1706_s9, 4  ;;  %s200_s10 = int_to_ptr.vmem [resolvable:$true] %s199_s10 }
   0xe   : > { %s214_s14 = sshll.u32 %s2129_s3, 4  ;;  %s2133_s15 = smov 64   ;;  %s215_s14 = int_to_ptr.hbm [resolvable:$true] %s214_s14 }
   0xf   : > { %p1443_p9 = pneg %p1791_p8  ;;  %s2134_s16 = smov 4  }
  0x10   : > { %s1709_s17 = smov [#allocation7]   ;;  %s228_s26 = sshll.u32 %s2130_s4, 4  ;;  %s229_s26 = int_to_ptr.hbm [resolvable:$true] %s228_s26 }
  0x11   : > { %p1799_p10 = pnand %p1443_p9, %p45_p1  ;;  %s216_s18 = sshll.u32 %s1709_s17, 4  ;;  %s217_s18 = int_to_ptr.vmem [resolvable:$true] %s216_s18 }
  0x12   : > { %s1710_s29 = smov [#allocation8]   ;;  %p38_p13 = scmp.ne.s32.totalorder %s1700_s23, %s1696_s22 }
  0x13   : > { %1446 = dma.hbm_to_vmem [thread:$0]  (!%p1799_p10), %s198_s7, 1024, %s200_s10, [#allocation6], %s2133_s15, %s2133_s15, %s2134_s16  }
  0x14   : > { %1449 = dma.hbm_to_vmem [thread:$0]  (!%p1799_p10), %s215_s14, 1024, %s217_s18, [#allocation6], %s2133_s15, %s2133_s15, %s2134_s16  }
  0x15   : > { %s230_s30 = sshll.u32 %s1710_s29, 4  ;;  %s1821_s7 = sadd.s32 1, %s1704_s24   ;;  %s231_s30 = int_to_ptr.vmem [resolvable:$true] %s230_s30 }
  0x16   : > { %1452 = dma.hbm_to_vmem [thread:$0]  (!%p1799_p10), %s229_s26, 1024, %s231_s30, [#allocation9], %s2133_s15, %s2133_s15, %s2134_s16  }
  0x17   : > { %s28_s9 = ssub.s32 %s1704_s24, %s1821_s7  ;;  %s31_s10 = sadd.s32 1, %s1700_s23 }
  0x18   : > { %p29_p12 = scmp.eq.s32.totalorder %s28_s9, 0  ;;  %p39_p0 = scmp.eq.s32.totalorder %s1704_s24, 0 }
  0x19   : > { %p1839_p3 = por %p173_p2, %p38_p13  ;;  %p1464_p5 = scmp.lt.s32.totalorder %s1704_s24, 2 }
  0x1a   : > { %s1835_s12 = scalar_select %p29_p12, %s1700_s23, %s31_s10  }
  0x1b   : > { %s247_s14 = sand.u32 1, %s1700_s23   ;;  %s1361_s11 = sshll.u32 %s1704_s24, 7 }
  0x1c   : > { %p40_p7 = por %p39_p0, %p38_p13  ;;  %s1187_s17 = sshll.u32 %s247_s14, 7 }
  0x1d   : > { %s256_s20 = scalar_lea.hbm %s2126_s0, %s1361_s11  ;;  %s251_s29 = scalar_lea.vmem [#allocation2], %s1187_s17 }
  0x1e   : > { %s257_s26 = sshll.u32 %s256_s20, 4  ;;  %s259_s30 = sshll.u32 %s251_s29, 4  ;;  %s258_s26 = int_to_ptr.hbm [resolvable:$true] %s257_s26  ;;  %s260_s30 = int_to_ptr.vmem [resolvable:$true] %s259_s30 }
  0x1f   : > { %p1849_p9 = pnand %p1464_p5, %p40_p7  ;;  %s248_s10 = scalar_lea.sflag [#allocation3], %s247_s14 }
  0x20   : > { %s1600_s15 = sshra.s32 %s258_s26, 4  ;;  %s1607_s17 = scalar_lea.hbm %s2126_s0, 256  ;;  %s1601_s15 = int_to_ptr.hbm [resolvable:$true] %s1600_s15 }
  0x21   : > { %s1602_s16 = scalar_lea.hbm %s1601_s15, 128  ;;  %p1604_p10 = pneg %p1849_p9 }
  0x22   : > { %p1603_p2 = scmp.ne.s32.totalorder %s1601_s15, %s1602_s16  ;;  %p1608_p0 = scmp.lt.s32.totalorder %s1601_s15, %s2126_s0 }
  0x23   : > { %p1609_p5 = scmp.lt.s32.totalorder %s1607_s17, %s1602_s16 }
  0x24   : > { %p1605_p12 = pnand %p1604_p10, %p1603_p2 }
  0x25   : > { %p1610_p7 = por %p1609_p5, %p1608_p0 }
  0x26   : > { %p1606_p13 = pneg %p1605_p12 }
  0x28   : > { %p1611_p11 = pnand %p1610_p7, %p1606_p13 }
  0x2a   : > { %1614 = shalt.err (!%p1611_p11)
}
  0x2b   : > { %s2141_s14 = smov 4   ;;  %s2142_s29 = smov 64  }
  0x2c   : > { %1456 = dma.hbm_to_vmem [thread:$0]  (!%p1849_p9), %s258_s26, 2048, %s260_s30, %s248_s10, %s2142_s29, %s2142_s29, %s2141_s14  }
  0x2d   : > { %271 = sbr.rel (%p1791_p8) target bundleno = 553 (0x229), region = 44  ;;  %s1869_s11 = sand.u32 (!%p1791_p8), 1, %s1696_s22  }
  0x2e   : > { %s1191_s15 = sshll.u32 (!%p1791_p8), %s1869_s11, 7  ;;  %s274_s16 = scalar_lea.sflag (!%p1791_p8), [#allocation3], %s1869_s11 }
  0x2f   : > { %s1873_s18 = scalar_lea.vmem (!%p1791_p8), [#allocation2], %s1191_s15 }
  0x32   : > { %1675 = dma.done.wait (%p1778_p4), %s274_s16, 2048  }
  0x33   : > { %1677 = vsyncadd (%p1778_p4), %s274_s16, 4294965248 }
  0x34   : > { %1679 = dma.done.wait (%p45_p1), [#allocation6], 2048  }
  0x35   : > { %1681 = vsyncadd (%p45_p1), [#allocation6], 4294965248 }
  0x36   : > { %1683 = dma.done.wait (%p45_p1), [#allocation9], 1024  }
  0x37   : > { %1685 = vsyncadd (%p45_p1), [#allocation9], 4294966272  ;;  %v1385_v0 = vld [vmem:[#allocation5 + $0x38] sm:$0xff]  ;;  %v1384_v1 = vld [vmem:[#allocation5 + $0x30] sm:$0xff]  ;;  %s1195_s9 = sshll.u32 %s1869_s11, 8  ;;  %s1402_s17 = sshll.u32 %s1769_s25, 8 }
  0x38   : > { %520 = vmatpush.bf16.msra.mxu0 %v1385_v0  ;;  %1403 = vmatpush.bf16.msra.mxu3 %v1385_v0  ;;  %v1383_v2 = vld [vmem:[#allocation5 + $0x28] sm:$0xff]  ;;  %v1382_v3 = vld [vmem:[#allocation5 + $0x20] sm:$0xff]  ;;  %v1381_v4 = vld [vmem:[#allocation5 + $0x18] sm:$0xff]  ;;  %s2010_s10 = scalar_lea.vmem [#allocation10], %s1195_s9  ;;  %s1075_s14 = scalar_lea.hbm %s2132_s6, %s1402_s17 }
  0x39   : > { %v1380_v5 = vld [vmem:[#allocation5 + $0x10] sm:$0xff]  ;;  %v1379_v6 = vld [vmem:[#allocation5 + $0x8] sm:$0xff]  ;;  %v1378_v7 = vld [vmem:[#allocation5] sm:$0xff]  ;;  %s1076_s29 = sshll.u32 %s2010_s10, 4  ;;  %s1078_s15 = sshll.u32 %s1075_s14, 4  ;;  %s1077_s29 = int_to_ptr.vmem [resolvable:$true] %s1076_s29  ;;  %s1079_s15 = int_to_ptr.hbm [resolvable:$true] %s1078_s15 }
  0x3a   : > { %v1888_v8 = vld [vmem:[%s1873_s18] sm:$0xff]  ;;  %v1892_v9 = vld [vmem:[%s1873_s18 + $0x8] sm:$0xff]  ;;  %v1897_v11 = vld [vmem:[%s1873_s18 + $0x10] sm:$0xff]  ;;  %s1064_s16 = scalar_lea.sflag [#allocation4], %s1869_s11  ;;  %s1644_s25 = sshra.s32 %s1079_s15, 4  ;;  %s1645_s25 = int_to_ptr.hbm [resolvable:$true] %s1644_s25 }
  0x3b   : > { %v1374_v10 = vld [vmem:[%s1873_s18 + $0x60] sm:$0xff]  ;;  %v1375_v12 = vld [vmem:[%s1873_s18 + $0x68] sm:$0xff]  ;;  %v1902_v13 = vld [vmem:[%s1873_s18 + $0x18] sm:$0xff]  ;;  %s1650_s26 = scalar_lea.hbm %s2132_s6, 512  ;;  %p1651_p11 = scmp.lt.s32.totalorder %s1645_s25, %s2132_s6 }
  0x3c   : > { %521 = vmatpush.bf16.msra.mxu0 %v1384_v1  ;;  %1404 = vmatpush.bf16.msra.mxu3 %v1384_v1  ;;  %v1906_v14 = vld [vmem:[%s1873_s18 + $0x70] sm:$0xff]  ;;  %v1910_v15 = vld [vmem:[%s1873_s18 + $0x20] sm:$0xff]  ;;  %v1914_v16 = vld [vmem:[%s1873_s18 + $0x78] sm:$0xff] }
  0x3d   : > { %v1401_v17 = vld [vmem:[#allocation8 + $0x38] sm:$0xff]  ;;  %v1400_v19 = vld [vmem:[#allocation8 + $0x30] sm:$0xff]  ;;  %v1399_v20 = vld [vmem:[#allocation8 + $0x28] sm:$0xff] }
  0x3e   : > { %v1393_v18 = vld [vmem:[#allocation7 + $0x38] sm:$0xff]  ;;  %737 = vmatpush.bf16.msra.mxu1 %v1401_v17  ;;  %v1918_v21 = vld [vmem:[%s1873_s18 + $0x28] sm:$0xff]  ;;  %v1398_v22 = vld [vmem:[#allocation8 + $0x20] sm:$0xff] }
  0x3f   : > { %874 = vmatpush.bf16.msra.mxu2 %v1393_v18  ;;  %v1392_v23 = vld [vmem:[#allocation7 + $0x30] sm:$0xff]  ;;  %v1397_v24 = vld [vmem:[#allocation8 + $0x18] sm:$0xff]  ;;  %v1391_v25 = vld [vmem:[#allocation7 + $0x28] sm:$0xff] }
  0x40   : > { %522 = vmatpush.bf16.msra.mxu0 %v1383_v2  ;;  %1405 = vmatpush.bf16.msra.mxu3 %v1383_v2  ;;  %v1396_v26 = vld [vmem:[#allocation8 + $0x10] sm:$0xff]  ;;  %v1390_v27 = vld [vmem:[#allocation7 + $0x20] sm:$0xff]  ;;  %v1395_v28 = vld [vmem:[#allocation8 + $0x8] sm:$0xff] }
  0x41   : > { %v1389_v29 = vld [vmem:[#allocation7 + $0x18] sm:$0xff]  ;;  %v1922_v30 = vld [vmem:[%s1873_s18 + $0x30] sm:$0xff]  ;;  %v1394_v31 = vld [vmem:[#allocation8] sm:$0xff] }
  0x42   : > { %738 = vmatpush.bf16.msra.mxu1 %v1400_v19  ;;  %v1388_v32 = vld [vmem:[#allocation7 + $0x10] sm:$0xff]  ;;  %v1387_v33 = vld [vmem:[#allocation7 + $0x8] sm:$0xff]  ;;  %v1386_v34 = vld [vmem:[#allocation7] sm:$0xff] }
  0x43   : > { %875 = vmatpush.bf16.msra.mxu2 %v1392_v23  ;;  %v1927_v35 = vld [vmem:[%s1873_s18 + $0x38] sm:$0xff]  ;;  %v1932_v36 = vld [vmem:[%s1873_s18 + $0x40] sm:$0xff]  ;;  %v1945_v45 = vld [vmem:[%s1873_s18 + $0x48] sm:$0xff] }
  0x44   : > { %523 = vmatpush.bf16.msra.mxu0 %v1382_v3  ;;  %1406 = vmatpush.bf16.msra.mxu3 %v1382_v3  ;;  %v1937_v38 = vld [vmem:[%s2128_s2] ss:$0 sm:$0xff]  ;;  %v1954_v55 = vld [vmem:[%s1873_s18 + $0x50] sm:$0xff] }
  0x46   : > { %739 = vmatpush.bf16.msra.mxu1 %v1399_v20 }
  0x47   : > { %876 = vmatpush.bf16.msra.mxu2 %v1391_v25 }
  0x48   : > { %524 = vmatpush.bf16.msra.mxu0 %v1381_v4  ;;  %1407 = vmatpush.bf16.msra.mxu3 %v1381_v4 }
  0x4a   : > { %740 = vmatpush.bf16.msra.mxu1 %v1398_v22 }
  0x4b   : > { %877 = vmatpush.bf16.msra.mxu2 %v1390_v27 }
  0x4c   : > { %525 = vmatpush.bf16.msra.mxu0 %v1380_v5  ;;  %1408 = vmatpush.bf16.msra.mxu3 %v1380_v5 }
  0x4e   : > { %741 = vmatpush.bf16.msra.mxu1 %v1397_v24 }
  0x4f   : > { %878 = vmatpush.bf16.msra.mxu2 %v1389_v29 }
  0x50   : > { %526 = vmatpush.bf16.msra.mxu0 %v1379_v6  ;;  %1409 = vmatpush.bf16.msra.mxu3 %v1379_v6  ;;  %v1963_v6 = vld [vmem:[%s1873_s18 + $0x58] sm:$0xff]  ;;  %s1646_s18 = scalar_lea.hbm %s1645_s25, 256 }
  0x51   : > { %p1647_p1 = scmp.ne.s32.totalorder %s1645_s25, %s1646_s18  ;;  %p1652_p9 = scmp.lt.s32.totalorder %s1650_s26, %s1646_s18 }
  0x52   : > { %742 = vmatpush.bf16.msra.mxu1 %v1396_v26 }
  0x53   : > { %879 = vmatpush.bf16.msra.mxu2 %v1388_v32  ;;  %p1648_p4 = pnand %p1647_p1, %p1839_p3  ;;  %p1653_p2 = por %p1652_p9, %p1651_p11 }
  0x54   : > { %527 = vmatpush.bf16.msra.mxu0 %v1378_v7  ;;  %1410 = vmatpush.bf16.msra.mxu3 %v1378_v7 }
  0x55   : > { %p1649_p8 = pneg %p1648_p4 }
  0x56   : > { %743 = vmatpush.bf16.msra.mxu1 %v1395_v28 }
  0x57   : > { %528 = vmatmul.bf16.vlgmr.msra.gmra.mxu0 %v1888_v8  ;;  %588 = vmatmul.bf16.vlgmr.msra.gmra.mxu3 %v1374_v10  ;;  %p1654_p10 = pnand %p1653_p2, %p1649_p8 }
  0x58   : > { %1411 = vmatpush.bf16.msrb.mxu3 %v1401_v17  ;;  %880 = vmatpush.bf16.msra.mxu2 %v1387_v33 }
  0x5a   : > { %744 = vmatpush.bf16.msra.mxu1 %v1394_v31 }
  0x5c   : > { %1412 = vmatpush.bf16.msrb.mxu3 %v1400_v19  ;;  %881 = vmatpush.bf16.msra.mxu2 %v1386_v34 }
  0x5d   : > { %745 = vmatmul.bf16.vlgmr.msra.gmra.mxu1 %v1888_v8 }
  0x60   : > { %1413 = vmatpush.bf16.msrb.mxu3 %v1399_v20 }
  0x64   : > { %1414 = vmatpush.bf16.msrb.mxu3 %v1398_v22 }
  0x67   : > { %533 = vmatmul.bf16.gmra.mxu0 %v1892_v9  ;;  %593 = vmatmul.bf16.gmra.mxu3 %v1375_v12 }
  0x68   : > { %1415 = vmatpush.bf16.msrb.mxu3 %v1397_v24 }
  0x6c   : > { %1416 = vmatpush.bf16.msrb.mxu3 %v1396_v26 }
  0x6d   : > { %750 = vmatmul.bf16.gmra.mxu1 %v1892_v9 }
  0x70   : > { %1417 = vmatpush.bf16.msrb.mxu3 %v1395_v28 }
  0x74   : > { %1418 = vmatpush.bf16.msrb.mxu3 %v1394_v31 }
  0x77   : > { %538 = vmatmul.bf16.gmra.mxu0 %v1897_v11  ;;  %598 = vmatmul.bf16.gmra.mxu3 %v1906_v14 }
  0x78   : > { %1419 = vmatpush.bf16.msra.mxu3 %v1393_v18 }
  0x7c   : > { %1420 = vmatpush.bf16.msra.mxu3 %v1392_v23 }
  0x7d   : > { %755 = vmatmul.bf16.gmra.mxu1 %v1897_v11 }
  0x80   : > { %1421 = vmatpush.bf16.msra.mxu3 %v1391_v25 }
  0x84   : > { %1422 = vmatpush.bf16.msra.mxu3 %v1390_v27 }
  0x87   : > { %543 = vmatmul.bf16.gmra.mxu0 %v1902_v13  ;;  %603 = vmatmul.bf16.gmra.mxu3 %v1914_v16 }
  0x88   : > { %1423 = vmatpush.bf16.msra.mxu3 %v1389_v29 }
  0x8c   : > { %1424 = vmatpush.bf16.msra.mxu3 %v1388_v32 }
  0x8d   : > { %760 = vmatmul.bf16.gmra.mxu1 %v1902_v13 }
  0x90   : > { %1425 = vmatpush.bf16.msra.mxu3 %v1387_v33 }
  0x94   : > { %1426 = vmatpush.bf16.msra.mxu3 %v1386_v34 }
  0x97   : > { %548 = vmatmul.bf16.gmra.mxu0 %v1910_v15  ;;  %805 = vmatmul.bf16.vlgmr.msrb.gmra.mxu3 %v1374_v10 }
  0x9d   : > { %765 = vmatmul.bf16.gmra.mxu1 %v1910_v15 }
  0xa7   : > { %553 = vmatmul.bf16.gmra.mxu0 %v1918_v21  ;;  %810 = vmatmul.bf16.gmra.mxu3 %v1375_v12 }
  0xad   : > { %770 = vmatmul.bf16.gmra.mxu1 %v1918_v21 }
  0xb7   : > { %558 = vmatmul.bf16.gmra.mxu0 %v1922_v30  ;;  %815 = vmatmul.bf16.gmra.mxu3 %v1906_v14 }
  0xbd   : > { %775 = vmatmul.bf16.gmra.mxu1 %v1922_v30 }
  0xc7   : > { %563 = vmatmul.bf16.gmra.mxu0 %v1927_v35  ;;  %820 = vmatmul.bf16.gmra.mxu3 %v1914_v16 }
  0xcd   : > { %780 = vmatmul.bf16.gmra.mxu1 %v1927_v35 }
  0xd4   : > { %v529_v37 = vpop.f32.mrf.mxu0 }
  0xd5   : > { %v530_v39 = vadd.f32 %v1937_v38, %v529_v37 }
  0xd7   : > { %568 = vmatmul.bf16.gmra.mxu0 %v1932_v36  ;;  %v609_v42 = vmax.f32 %v530_v39, 0.0 }
  0xda   : > { %v589_v49 = vpop.f32.mrf.mxu3 }
  0xdb   : > { %v590_v54 = vadd.f32 %v1937_v38, %v589_v49 }
  0xdc   : > { %v531_v40 = vpop.f32.mrf.mxu0 }
  0xdd   : > { %v532_v41 = vadd.f32 %v1937_v38, %v531_v40  ;;  %v633_v58 = vmax.f32 %v590_v54, 0.0  ;;  %785 = vmatmul.bf16.gmra.mxu1 %v1932_v36 }
  0xdf   : > { %v610_v43 = vmax.f32 %v532_v41, 0.0 }
  0xe1   : > { %v641_v44 = vpack.c.bf16 %v610_v43, %v609_v42 }
  0xe2   : > { %v591_v57 = vpop.f32.mrf.mxu3 }
  0xe3   : > { %882 = vmatmul.bf16.vlgmr.msra.gmra.mxu2 %v641_v44  ;;  %v592_v59 = vadd.f32 %v1937_v38, %v591_v57 }
  0xe4   : > { %v534_v46 = vpop.f32.mrf.mxu0 }
  0xe5   : > { %v535_v47 = vadd.f32 %v1937_v38, %v534_v46  ;;  %v634_v60 = vmax.f32 %v592_v59, 0.0 }
  0xe7   : > { %573 = vmatmul.bf16.gmra.mxu0 %v1945_v45  ;;  %v611_v51 = vmax.f32 %v535_v47, 0.0  ;;  %v653_v61 = vpack.c.bf16 %v634_v60, %v633_v58 }
  0xe9   : > { %942 = vmatmul.bf16.vlgmr.msra.gmra.mxu3 %v653_v61 }
  0xea   : > { %v594_v0 = vpop.f32.mrf.mxu3 }
  0xeb   : > { %v595_v5 = vadd.f32 %v1937_v38, %v594_v0 }
  0xec   : > { %v536_v48 = vpop.f32.mrf.mxu0 }
  0xed   : > { %v537_v50 = vadd.f32 %v1937_v38, %v536_v48  ;;  %v635_v9 = vmax.f32 %v595_v5, 0.0  ;;  %790 = vmatmul.bf16.gmra.mxu1 %v1945_v45 }
  0xef   : > { %v612_v52 = vmax.f32 %v537_v50, 0.0 }
  0xf1   : > { %v642_v53 = vpack.c.bf16 %v612_v52, %v611_v51 }
  0xf2   : > { %v596_v8 = vpop.f32.mrf.mxu3 }
  0xf3   : > { %887 = vmatmul.bf16.gmra.mxu2 %v642_v53  ;;  %v597_v10 = vadd.f32 %v1937_v38, %v596_v8 }
  0xf4   : > { %v539_v56 = vpop.f32.mrf.mxu0 }
  0xf5   : > { %v540_v62 = vadd.f32 %v1937_v38, %v539_v56  ;;  %v636_v11 = vmax.f32 %v597_v10, 0.0  ;;  %v746_v56 = vpop.f32.mrf.mxu1 }
  0xf7   : > { %578 = vmatmul.bf16.gmra.mxu0 %v1954_v55  ;;  %v613_v2 = vmax.f32 %v540_v62, 0.0  ;;  %v654_v12 = vpack.c.bf16 %v636_v11, %v635_v9 }
  0xf9   : > { %947 = vmatmul.bf16.gmra.mxu3 %v654_v12 }
  0xfa   : > { %v599_v15 = vpop.f32.mrf.mxu3 }
  0xfb   : > { %v600_v20 = vadd.f32 %v1937_v38, %v599_v15 }
  0xfc   : > { %v541_v63 = vpop.f32.mrf.mxu0 }
  0xfd   : > { %v542_v1 = vadd.f32 %v1937_v38, %v541_v63  ;;  %v637_v24 = vmax.f32 %v600_v20, 0.0  ;;  %v748_v61 = vpop.f32.mrf.mxu1  ;;  %795 = vmatmul.bf16.gmra.mxu1 %v1954_v55 }
  0xff   : > { %v614_v3 = vmax.f32 %v542_v1, 0.0 }
 0x101   : > { %v643_v4 = vpack.c.bf16 %v614_v3, %v613_v2 }
 0x102   : > { %v601_v23 = vpop.f32.mrf.mxu3 }
 0x103   : > { %892 = vmatmul.bf16.gmra.mxu2 %v643_v4  ;;  %v602_v25 = vadd.f32 %v1937_v38, %v601_v23 }
 0x104   : > { %v544_v7 = vpop.f32.mrf.mxu0 }
 0x105   : > { %v545_v13 = vadd.f32 %v1937_v38, %v544_v7  ;;  %v638_v26 = vmax.f32 %v602_v25, 0.0  ;;  %v751_v1 = vpop.f32.mrf.mxu1 }
 0x107   : > { %583 = vmatmul.bf16.gmra.mxu0 %v1963_v6  ;;  %v615_v17 = vmax.f32 %v545_v13, 0.0  ;;  %v655_v27 = vpack.c.bf16 %v638_v26, %v637_v24 }
 0x109   : > { %952 = vmatmul.bf16.gmra.mxu3 %v655_v27 }
 0x10a   : > { %v604_v21 = vpop.f32.mrf.mxu3 }
 0x10b   : > { %v605_v37 = vadd.f32 %v1937_v38, %v604_v21 }
 0x10c   : > { %v546_v14 = vpop.f32.mrf.mxu0 }
 0x10d   : > { %v547_v16 = vadd.f32 %v1937_v38, %v546_v14  ;;  %v639_v41 = vmax.f32 %v605_v37, 0.0  ;;  %v753_v8 = vpop.f32.mrf.mxu1  ;;  %800 = vmatmul.bf16.gmra.mxu1 %v1963_v6 }
 0x10f   : > { %v616_v18 = vmax.f32 %v547_v16, 0.0 }
 0x111   : > { %v644_v19 = vpack.c.bf16 %v616_v18, %v615_v17  ;;  %v2002_v18 = vld [vmem:[%s2131_s5] ss:$0 sm:$0xff] }
 0x112   : > { %v606_v40 = vpop.f32.mrf.mxu3 }
 0x113   : > { %897 = vmatmul.bf16.gmra.mxu2 %v644_v19  ;;  %v607_v42 = vadd.f32 %v1937_v38, %v606_v40 }
 0x114   : > { %v549_v22 = vpop.f32.mrf.mxu0 }
 0x115   : > { %v550_v28 = vadd.f32 %v1937_v38, %v549_v22  ;;  %v640_v43 = vmax.f32 %v607_v42, 0.0  ;;  %v756_v15 = vpop.f32.mrf.mxu1 }
 0x117   : > { %v617_v32 = vmax.f32 %v550_v28, 0.0  ;;  %v656_v44 = vpack.c.bf16 %v640_v43, %v639_v41 }
 0x119   : > { %957 = vmatmul.bf16.gmra.mxu3 %v656_v44 }
 0x11a   : > { %v1983_v57 = vpop.f32.mrf.mxu3 }
 0x11c   : > { %v551_v29 = vpop.f32.mrf.mxu0 }
 0x11d   : > { %v552_v31 = vadd.f32 %v1937_v38, %v551_v29  ;;  %v758_v23 = vpop.f32.mrf.mxu1 }
 0x11f   : > { %v618_v33 = vmax.f32 %v552_v31, 0.0 }
 0x121   : > { %v645_v34 = vpack.c.bf16 %v618_v33, %v617_v32 }
 0x122   : > { %v1985_v62 = vpop.f32.mrf.mxu3 }
 0x123   : > { %902 = vmatmul.bf16.gmra.mxu2 %v645_v34 }
 0x124   : > { %v554_v39 = vpop.f32.mrf.mxu0 }
 0x125   : > { %v555_v46 = vadd.f32 %v1937_v38, %v554_v39  ;;  %v761_v39 = vpop.f32.mrf.mxu1 }
 0x127   : > { %v619_v48 = vmax.f32 %v555_v46, 0.0 }
 0x12a   : > { %v1990_v2 = vpop.f32.mrf.mxu3 }
 0x12c   : > { %v556_v47 = vpop.f32.mrf.mxu0 }
 0x12d   : > { %v557_v30 = vadd.f32 %v1937_v38, %v556_v47 }
 0x12f   : > { %v620_v49 = vmax.f32 %v557_v30, 0.0 }
 0x131   : > { %v646_v50 = vpack.c.bf16 %v620_v49, %v619_v48  ;;  %v763_v49 = vpop.f32.mrf.mxu1 }
 0x132   : > { %v1992_v9 = vpop.f32.mrf.mxu3 }
 0x133   : > { %907 = vmatmul.bf16.gmra.mxu2 %v646_v50 }
 0x134   : > { %v559_v51 = vpop.f32.mrf.mxu0 }
 0x135   : > { %v560_v52 = vadd.f32 %v1937_v38, %v559_v51 }
 0x137   : > { %v621_v58 = vmax.f32 %v560_v52, 0.0 }
 0x13a   : > { %v1997_v12 = vpop.f32.mrf.mxu3 }
 0x13c   : > { %v561_v53 = vpop.f32.mrf.mxu0 }
 0x13d   : > { %v562_v54 = vadd.f32 %v1937_v38, %v561_v53 }
 0x13f   : > { %v622_v59 = vmax.f32 %v562_v54, 0.0 }
 0x141   : > { %v647_v35 = vpack.c.bf16 %v622_v59, %v621_v58 }
 0x142   : > { %v2005_v22 = vpop.f32.mrf.mxu3 }
 0x143   : > { %912 = vmatmul.bf16.gmra.mxu2 %v647_v35 }
 0x144   : > { %v564_v60 = vpop.f32.mrf.mxu0 }
 0x145   : > { %v565_v63 = vadd.f32 %v1937_v38, %v564_v60 }
 0x147   : > { %v623_v3 = vmax.f32 %v565_v63, 0.0 }
 0x14a   : > { %v2014_v32 = vpop.f32.mrf.mxu3 }
 0x14c   : > { %v566_v0 = vpop.f32.mrf.mxu0 }
 0x14d   : > { %v567_v36 = vadd.f32 %v1937_v38, %v566_v0 }
 0x14f   : > { %v624_v4 = vmax.f32 %v567_v36, 0.0  ;;  %v766_v36 = vpop.f32.mrf.mxu1 }
 0x151   : > { %v648_v5 = vpack.c.bf16 %v624_v4, %v623_v3 }
 0x152   : > { %v2018_v42 = vpop.f32.mrf.mxu3 }
 0x153   : > { %917 = vmatmul.bf16.gmra.mxu2 %v648_v5 }
 0x154   : > { %v569_v7 = vpop.f32.mrf.mxu0 }
 0x155   : > { %v570_v10 = vadd.f32 %v1937_v38, %v569_v7 }
 0x157   : > { %v625_v13 = vmax.f32 %v570_v10, 0.0 }
 0x15c   : > { %v571_v11 = vpop.f32.mrf.mxu0 }
 0x15d   : > { %v572_v45 = vadd.f32 %v1937_v38, %v571_v11 }
 0x15f   : > { %v626_v14 = vmax.f32 %v572_v45, 0.0 }
 0x161   : > { %v649_v16 = vpack.c.bf16 %v626_v14, %v625_v13 }
 0x163   : > { %922 = vmatmul.bf16.gmra.mxu2 %v649_v16 }
 0x164   : > { %v574_v17 = vpop.f32.mrf.mxu0 }
 0x165   : > { %v575_v24 = vadd.f32 %v1937_v38, %v574_v17 }
 0x166   : > { %v883_v19 = vpop.f32.mrf.mxu2 }
 0x167   : > { %v884_v20 = vadd.f32 %v883_v19, %v746_v56  ;;  %v627_v29 = vmax.f32 %v575_v24, 0.0  ;;  %v768_v19 = vpop.f32.mrf.mxu1 }
 0x169   : > { %v967_v55 = vadd.f32 %v2002_v18, %v884_v20 }
 0x16b   : > { %v999_v25 = vmax.f32 %v967_v55, 0.0 }
 0x16c   : > { %v576_v26 = vpop.f32.mrf.mxu0  ;;  %v943_v53 = vpop.f32.mrf.mxu3 }
 0x16d   : > { %1031 = vst [vmem:[%s2010_s10] sm:$0xff] %v999_v25  ;;  %v577_v27 = vadd.f32 %v1937_v38, %v576_v26  ;;  %v944_v35 = vadd.f32 %v943_v53, %v1983_v57 }
 0x16e   : > { %v885_v28 = vpop.f32.mrf.mxu2 }
 0x16f   : > { %v628_v21 = vmax.f32 %v577_v27, 0.0  ;;  %v886_v31 = vadd.f32 %v885_v28, %v748_v61  ;;  %v991_v63 = vadd.f32 %v2002_v18, %v944_v35 }
 0x171   : > { %v968_v33 = vadd.f32 %v2002_v18, %v886_v31  ;;  %v650_v34 = vpack.c.bf16 %v628_v21, %v627_v29  ;;  %v1023_v4 = vmax.f32 %v991_v63, 0.0  ;;  %v771_v31 = vpop.f32.mrf.mxu1 }
 0x173   : > { %v1000_v37 = vmax.f32 %v968_v33, 0.0  ;;  %927 = vmatmul.bf16.gmra.mxu2 %v650_v34  ;;  %1055 = vst [vmem:[%s2010_s10 + $0xc0] sm:$0xff] %v1023_v4 }
 0x174   : > { %v579_v6 = vpop.f32.mrf.mxu0  ;;  %v945_v0 = vpop.f32.mrf.mxu3 }
 0x175   : > { %1032 = vst [vmem:[%s2010_s10 + $0x8] sm:$0xff] %v1000_v37  ;;  %v580_v44 = vadd.f32 %v1937_v38, %v579_v6 }
 0x176   : > { %v888_v40 = vpop.f32.mrf.mxu2 }
 0x177   : > { %v889_v41 = vadd.f32 %v888_v40, %v751_v1  ;;  %v629_v50 = vmax.f32 %v580_v44, 0.0  ;;  %v946_v1 = vadd.f32 %v945_v0, %v1985_v62 }
 0x179   : > { %v969_v43 = vadd.f32 %v2002_v18, %v889_v41  ;;  %v992_v5 = vadd.f32 %v2002_v18, %v946_v1  ;;  %v773_v41 = vpop.f32.mrf.mxu1 }
 0x17b   : > { %v1001_v46 = vmax.f32 %v969_v43, 0.0  ;;  %v1024_v10 = vmax.f32 %v992_v5, 0.0 }
 0x17c   : > { %v581_v47 = vpop.f32.mrf.mxu0 }
 0x17d   : > { %1033 = vst [vmem:[%s2010_s10 + $0x10] sm:$0xff] %v1001_v46  ;;  %v582_v30 = vadd.f32 %v1937_v38, %v581_v47 }
 0x17e   : > { %v890_v48 = vpop.f32.mrf.mxu2  ;;  %1056 = vst [vmem:[%s2010_s10 + $0xc8] sm:$0xff] %v1024_v10 }
 0x17f   : > { %v630_v51 = vmax.f32 %v582_v30, 0.0  ;;  %v891_v52 = vadd.f32 %v890_v48, %v753_v8 }
 0x181   : > { %v970_v54 = vadd.f32 %v2002_v18, %v891_v52  ;;  %v651_v56 = vpack.c.bf16 %v630_v51, %v629_v50 }
 0x183   : > { %v1002_v58 = vmax.f32 %v970_v54, 0.0  ;;  %932 = vmatmul.bf16.gmra.mxu2 %v651_v56  ;;  %v776_v54 = vpop.f32.mrf.mxu1 }
 0x184   : > { %v584_v59 = vpop.f32.mrf.mxu0 }
 0x185   : > { %1034 = vst [vmem:[%s2010_s10 + $0x18] sm:$0xff] %v1002_v58  ;;  %v585_v7 = vadd.f32 %v1937_v38, %v584_v59 }
 0x186   : > { %v893_v60 = vpop.f32.mrf.mxu2 }
 0x187   : > { %v894_v61 = vadd.f32 %v893_v60, %v756_v15  ;;  %v631_v13 = vmax.f32 %v585_v7, 0.0  ;;  %v948_v15 = vpop.f32.mrf.mxu3 }
 0x188   : > { %v949_v55 = vadd.f32 %v948_v15, %v1990_v2 }
 0x189   : > { %v971_v3 = vadd.f32 %v2002_v18, %v894_v61 }
 0x18a   : > { %v993_v25 = vadd.f32 %v2002_v18, %v949_v55 }
 0x18b   : > { %v1003_v8 = vmax.f32 %v971_v3, 0.0  ;;  %v778_v1 = vpop.f32.mrf.mxu1 }
 0x18c   : > { %v586_v57 = vpop.f32.mrf.mxu0  ;;  %v1025_v28 = vmax.f32 %v993_v25, 0.0 }
 0x18d   : > { %1035 = vst [vmem:[%s2010_s10 + $0x20] sm:$0xff] %v1003_v8  ;;  %v587_v11 = vadd.f32 %v1937_v38, %v586_v57 }
 0x18e   : > { %v895_v45 = vpop.f32.mrf.mxu2  ;;  %1057 = vst [vmem:[%s2010_s10 + $0xd0] sm:$0xff] %v1025_v28 }
 0x18f   : > { %v632_v14 = vmax.f32 %v587_v11, 0.0  ;;  %v896_v62 = vadd.f32 %v895_v45, %v758_v23  ;;  %v950_v26 = vpop.f32.mrf.mxu3 }
 0x190   : > { %v951_v23 = vadd.f32 %v950_v26, %v1992_v9 }
 0x191   : > { %v972_v16 = vadd.f32 %v2002_v18, %v896_v62  ;;  %v652_v17 = vpack.c.bf16 %v632_v14, %v631_v13 }
 0x192   : > { %v994_v29 = vadd.f32 %v2002_v18, %v951_v23 }
 0x193   : > { %v1004_v20 = vmax.f32 %v972_v16, 0.0  ;;  %937 = vmatmul.bf16.gmra.mxu2 %v652_v17  ;;  %v781_v10 = vpop.f32.mrf.mxu1 }
 0x194   : > { %v1026_v33 = vmax.f32 %v994_v29, 0.0 }
 0x195   : > { %1036 = vst [vmem:[%s2010_s10 + $0x28] sm:$0xff] %v1004_v20 }
 0x196   : > { %v898_v24 = vpop.f32.mrf.mxu2  ;;  %1058 = vst [vmem:[%s2010_s10 + $0xd8] sm:$0xff] %v1026_v33 }
 0x197   : > { %v899_v38 = vadd.f32 %v898_v24, %v761_v39  ;;  %v953_v37 = vpop.f32.mrf.mxu3 }
 0x198   : > { %v954_v9 = vadd.f32 %v953_v37, %v1997_v12 }
 0x199   : > { %v973_v27 = vadd.f32 %v2002_v18, %v899_v38 }
 0x19a   : > { %v995_v44 = vadd.f32 %v2002_v18, %v954_v9 }
 0x19b   : > { %v1005_v21 = vmax.f32 %v973_v27, 0.0  ;;  %v783_v62 = vpop.f32.mrf.mxu1 }
 0x19c   : > { %v1027_v48 = vmax.f32 %v995_v44, 0.0 }
 0x19d   : > { %1037 = vst [vmem:[%s2010_s10 + $0x30] sm:$0xff] %v1005_v21 }
 0x19e   : > { %v900_v34 = vpop.f32.mrf.mxu2  ;;  %1059 = vst [vmem:[%s2010_s10 + $0xe0] sm:$0xff] %v1027_v48 }
 0x19f   : > { %v901_v2 = vadd.f32 %v900_v34, %v763_v49  ;;  %v955_v46 = vpop.f32.mrf.mxu3 }
 0x1a0   : > { %v956_v47 = vadd.f32 %v955_v46, %v2005_v22 }
 0x1a1   : > { %v974_v6 = vadd.f32 %v2002_v18, %v901_v2 }
 0x1a2   : > { %v996_v49 = vadd.f32 %v2002_v18, %v956_v47 }
 0x1a3   : > { %v1006_v39 = vmax.f32 %v974_v6, 0.0  ;;  %v786_v55 = vpop.f32.mrf.mxu1 }
 0x1a4   : > { %v1028_v51 = vmax.f32 %v996_v49, 0.0 }
 0x1a5   : > { %1038 = vst [vmem:[%s2010_s10 + $0x38] sm:$0xff] %v1006_v39 }
 0x1a6   : > { %v903_v40 = vpop.f32.mrf.mxu2  ;;  %1060 = vst [vmem:[%s2010_s10 + $0xe8] sm:$0xff] %v1028_v51 }
 0x1a7   : > { %v904_v43 = vadd.f32 %v903_v40, %v766_v36  ;;  %v958_v53 = vpop.f32.mrf.mxu3 }
 0x1a8   : > { %v959_v22 = vadd.f32 %v958_v53, %v2014_v32 }
 0x1a9   : > { %v975_v30 = vadd.f32 %v2002_v18, %v904_v43 }
 0x1aa   : > { %v997_v60 = vadd.f32 %v2002_v18, %v959_v22 }
 0x1ab   : > { %v1007_v50 = vmax.f32 %v975_v30, 0.0  ;;  %v788_v27 = vpop.f32.mrf.mxu1 }
 0x1ac   : > { %v1029_v36 = vmax.f32 %v997_v60, 0.0 }
 0x1ad   : > { %1039 = vst [vmem:[%s2010_s10 + $0x40] sm:$0xff] %v1007_v50 }
 0x1ae   : > { %v905_v52 = vpop.f32.mrf.mxu2  ;;  %1061 = vst [vmem:[%s2010_s10 + $0xf0] sm:$0xff] %v1029_v36 }
 0x1af   : > { %v906_v12 = vadd.f32 %v905_v52, %v768_v19  ;;  %v960_v61 = vpop.f32.mrf.mxu3 }
 0x1b0   : > { %v961_v63 = vadd.f32 %v960_v61, %v2018_v42 }
 0x1b1   : > { %v976_v56 = vadd.f32 %v2002_v18, %v906_v12 }
 0x1b2   : > { %v998_v3 = vadd.f32 %v2002_v18, %v961_v63 }
 0x1b3   : > { %v1008_v58 = vmax.f32 %v976_v56, 0.0  ;;  %v791_v34 = vpop.f32.mrf.mxu1 }
 0x1b4   : > { %v1030_v5 = vmax.f32 %v998_v3, 0.0 }
 0x1b5   : > { %1040 = vst [vmem:[%s2010_s10 + $0x48] sm:$0xff] %v1008_v58 }
 0x1b6   : > { %v908_v59 = vpop.f32.mrf.mxu2  ;;  %1062 = vst [vmem:[%s2010_s10 + $0xf8] sm:$0xff] %v1030_v5 }
 0x1b7   : > { %v909_v35 = vadd.f32 %v908_v59, %v771_v31 }
 0x1b9   : > { %v977_v0 = vadd.f32 %v2002_v18, %v909_v35 }
 0x1bb   : > { %v1009_v4 = vmax.f32 %v977_v0, 0.0  ;;  %v793_v9 = vpop.f32.mrf.mxu1 }
 0x1bd   : > { %1041 = vst [vmem:[%s2010_s10 + $0x50] sm:$0xff] %v1009_v4 }
 0x1be   : > { %v910_v32 = vpop.f32.mrf.mxu2 }
 0x1bf   : > { %v911_v7 = vadd.f32 %v910_v32, %v773_v41 }
 0x1c1   : > { %v978_v8 = vadd.f32 %v2002_v18, %v911_v7 }
 0x1c3   : > { %v1010_v57 = vmax.f32 %v978_v8, 0.0  ;;  %v796_v30 = vpop.f32.mrf.mxu1 }
 0x1c5   : > { %1042 = vst [vmem:[%s2010_s10 + $0x58] sm:$0xff] %v1010_v57 }
 0x1c6   : > { %v913_v42 = vpop.f32.mrf.mxu2 }
 0x1c7   : > { %v914_v11 = vadd.f32 %v913_v42, %v776_v54 }
 0x1c9   : > { %v979_v45 = vadd.f32 %v2002_v18, %v914_v11 }
 0x1cb   : > { %v1011_v13 = vmax.f32 %v979_v45, 0.0  ;;  %v798_v12 = vpop.f32.mrf.mxu1 }
 0x1cd   : > { %1043 = vst [vmem:[%s2010_s10 + $0x60] sm:$0xff] %v1011_v13 }
 0x1ce   : > { %v915_v14 = vpop.f32.mrf.mxu2 }
 0x1cf   : > { %v916_v15 = vadd.f32 %v915_v14, %v778_v1 }
 0x1d1   : > { %v980_v16 = vadd.f32 %v2002_v18, %v916_v15 }
 0x1d3   : > { %v1012_v17 = vmax.f32 %v980_v16, 0.0  ;;  %v801_v59 = vpop.f32.mrf.mxu1 }
 0x1d5   : > { %1044 = vst [vmem:[%s2010_s10 + $0x68] sm:$0xff] %v1012_v17 }
 0x1d6   : > { %v918_v19 = vpop.f32.mrf.mxu2 }
 0x1d7   : > { %v919_v20 = vadd.f32 %v918_v19, %v781_v10 }
 0x1d9   : > { %v981_v24 = vadd.f32 %v2002_v18, %v919_v20 }
 0x1db   : > { %v1013_v38 = vmax.f32 %v981_v24, 0.0  ;;  %v803_v0 = vpop.f32.mrf.mxu1 }
 0x1dd   : > { %1045 = vst [vmem:[%s2010_s10 + $0x70] sm:$0xff] %v1013_v38 }
 0x1de   : > { %v920_v25 = vpop.f32.mrf.mxu2 }
 0x1df   : > { %v921_v26 = vadd.f32 %v920_v25, %v783_v62 }
 0x1e1   : > { %v982_v23 = vadd.f32 %v2002_v18, %v921_v26 }
 0x1e3   : > { %v1014_v28 = vmax.f32 %v982_v23, 0.0 }
 0x1e5   : > { %1046 = vst [vmem:[%s2010_s10 + $0x78] sm:$0xff] %v1014_v28 }
 0x1e6   : > { %v923_v29 = vpop.f32.mrf.mxu2 }
 0x1e7   : > { %v924_v21 = vadd.f32 %v923_v29, %v786_v55 }
 0x1e9   : > { %v983_v31 = vadd.f32 %v2002_v18, %v924_v21 }
 0x1eb   : > { %v1015_v33 = vmax.f32 %v983_v31, 0.0 }
 0x1ed   : > { %1047 = vst [vmem:[%s2010_s10 + $0x80] sm:$0xff] %v1015_v33 }
 0x1ee   : > { %v925_v2 = vpop.f32.mrf.mxu2 }
 0x1ef   : > { %v926_v37 = vadd.f32 %v925_v2, %v788_v27 }
 0x1f1   : > { %v984_v6 = vadd.f32 %v2002_v18, %v926_v37 }
 0x1f3   : > { %v1016_v39 = vmax.f32 %v984_v6, 0.0 }
 0x1f5   : > { %1048 = vst [vmem:[%s2010_s10 + $0x88] sm:$0xff] %v1016_v39 }
 0x1f6   : > { %v928_v40 = vpop.f32.mrf.mxu2 }
 0x1f7   : > { %v929_v41 = vadd.f32 %v928_v40, %v791_v34 }
 0x1f9   : > { %v985_v43 = vadd.f32 %v2002_v18, %v929_v41 }
 0x1fb   : > { %v1017_v44 = vmax.f32 %v985_v43, 0.0 }
 0x1fd   : > { %1049 = vst [vmem:[%s2010_s10 + $0x90] sm:$0xff] %v1017_v44 }
 0x1fe   : > { %v930_v46 = vpop.f32.mrf.mxu2 }
 0x1ff   : > { %v931_v47 = vadd.f32 %v930_v46, %v793_v9 }
 0x201   : > { %v986_v48 = vadd.f32 %v2002_v18, %v931_v47 }
 0x203   : > { %v1018_v49 = vmax.f32 %v986_v48, 0.0 }
 0x205   : > { %1050 = vst [vmem:[%s2010_s10 + $0x98] sm:$0xff] %v1018_v49 }
 0x206   : > { %v933_v50 = vpop.f32.mrf.mxu2 }
 0x207   : > { %v934_v51 = vadd.f32 %v933_v50, %v796_v30 }
 0x209   : > { %v987_v52 = vadd.f32 %v2002_v18, %v934_v51 }
 0x20b   : > { %v1019_v53 = vmax.f32 %v987_v52, 0.0 }
 0x20d   : > { %1051 = vst [vmem:[%s2010_s10 + $0xa0] sm:$0xff] %v1019_v53 }
 0x20e   : > { %v935_v54 = vpop.f32.mrf.mxu2 }
 0x20f   : > { %v936_v56 = vadd.f32 %v935_v54, %v798_v12 }
 0x211   : > { %v988_v58 = vadd.f32 %v2002_v18, %v936_v56 }
 0x213   : > { %v1020_v22 = vmax.f32 %v988_v58, 0.0 }
 0x215   : > { %1052 = vst [vmem:[%s2010_s10 + $0xa8] sm:$0xff] %v1020_v22 }
 0x216   : > { %v938_v35 = vpop.f32.mrf.mxu2 }
 0x217   : > { %v939_v60 = vadd.f32 %v938_v35, %v801_v59 }
 0x219   : > { %v989_v61 = vadd.f32 %v2002_v18, %v939_v60 }
 0x21b   : > { %v1021_v63 = vmax.f32 %v989_v61, 0.0 }
 0x21d   : > { %1053 = vst [vmem:[%s2010_s10 + $0xb0] sm:$0xff] %v1021_v63 }
 0x21e   : > { %v940_v36 = vpop.f32.mrf.mxu2 }
 0x21f   : > { %v941_v1 = vadd.f32 %v940_v36, %v803_v0 }
 0x221   : > { %v990_v3 = vadd.f32 %v2002_v18, %v941_v1 }
 0x223   : > { %v1022_v4 = vmax.f32 %v990_v3, 0.0 }
 0x225   : > { %1054 = vst [vmem:[%s2010_s10 + $0xb8] sm:$0xff] %v1022_v4 }
 0x226   : > { %1657 = shalt.err (!%p1654_p10)
}
 0x227   : > { %s1711_s11 = smov 128   ;;  %s1712_s10 = smov 8  }
 0x228   : > { %1441 = dma.vmem_to_hbm [thread:$0]  (%p1839_p3), %s1077_s29, 4096, %s1079_s15, %s1064_s16, %s1711_s11, %s1711_s11, %s1712_s10  }
 0x229 PF: > { %s1093_s17 = sand.u32 1, %s1692_s21   ;;  %p2143_p12 = scmp.ge.s32.totalorder %s1704_s24, 2 }
 0x22a   : > { %s1094_s19 = scalar_lea.sflag [#allocation4], %s1093_s17 }
 0x22b   : > { %p1458_p13 = pnand %p2143_p12, %p1783_p6 }
 0x22d   : > { %p1459_p0 = pneg %p1458_p13 }
 0x22f   : > { %1687 = dma.done.wait (%p1459_p0), %s1094_s19, 4096  }
 0x230   : > { %1689 = vsyncadd (%p1459_p0), %s1094_s19, 4294963200  ;;  %p21_p5 = scmp.ge.s32.totalorder %s1821_s7, 4   ;;  %s2144_s21 = smov %s1696_s22 }
 0x231   : > { %s2145_s22 = smov %s1700_s23  ;;  %s2146_s23 = smov %s1835_s12 }
 0x232   : > { %s2147_s24 = smov %s1821_s7  ;;  %23 = sbr.rel (!%p21_p5) target bundleno = 7 (0x7), region = 101 }
 0x237   :  { %1100 = vsyncpa [#allocation3], 1 }
 0x238   :  { %1102 = vsyncpa [#allocation3 + $0x1], 1 }
 0x239   :  { %1103 = vsyncpa [#allocation6], 1 }
 0x23a   :  { %1104 = vsyncpa [#allocation9], 1 }
 0x23b   :  { %1105 = vsyncpa [#allocation4], 1 }
 0x23c   :  { %1107 = vsyncpa [#allocation4 + $0x1], 1 }

</bundles_post_ra>
